<compile_context>
chip_gen: v7x
topology: tpu7x:2x2x1
jax: 0.10.0
libtpu: 0.0.40
codegen_flags: <defaults>
</compile_context>

<pallas_src>
import functools
import math

import jax
import jax.numpy as jnp
from jax.experimental import pallas as pl
from jax.experimental.pallas import tpu as pltpu


def _round_up(x: int, mult: int) -> int:
    return ((x + mult - 1) // mult) * mult


# ----------------------------------------------------------------------------
# Fused kernel: encoder MLP -> posterior sample (reduced-variance mean draw) -> decoder MLP
# ----------------------------------------------------------------------------
def _dvae_fused_kernel(x_ref, noise_ref,
                       ew1_ref, eb1_ref, ew2_ref, eb2_ref, ew3_ref, eb3_ref,
                       dw1_ref, db1_ref, dw2_ref, db2_ref, dw3_ref, db3_ref,
                       logits_ref, recon_ref, *, noise_scale):
    def dense(a, w_ref, b_ref):
        return jnp.dot(a, w_ref[...], preferred_element_type=jnp.float32) + b_ref[...]

    # ---- Encoder: in -> 512 -> 256 -> code_dim ----
    x = x_ref[...]                                            # (TM, IN_PAD) bf16
    h = jnp.maximum(dense(x, ew1_ref, eb1_ref), 0.0).astype(jnp.bfloat16)
    h = jnp.maximum(dense(h, ew2_ref, eb2_ref), 0.0).astype(jnp.bfloat16)
    logits = dense(h, ew3_ref, eb3_ref)                       # (TM, CODE_PAD) f32
    logits_ref[...] = logits

    # ---- variational_posterior: Normal(loc=logits, scale=1), ScoreFunction n_samples=10,
    #      then mean over the sample dim  ==  logits + N(0, 1/n_samples) ----
    code = (logits + noise_ref[...] * noise_scale).astype(jnp.bfloat16)

    # ---- Decoder: code_dim -> 256 -> 512 -> in ----
    g = jnp.maximum(dense(code, dw1_ref, db1_ref), 0.0).astype(jnp.bfloat16)
    g = jnp.maximum(dense(g, dw2_ref, db2_ref), 0.0).astype(jnp.bfloat16)
    recon_ref[...] = dense(g, dw3_ref, db3_ref)               # (TM, IN_PAD) f32


def _dvae_fused(x_p, noise, enc, dec, *, tm, n_samples):
    b_pad, in_pad = x_p.shape
    code_pad = noise.shape[1]
    grid = (b_pad // tm,)

    kernel = functools.partial(_dvae_fused_kernel,
                               noise_scale=1.0 / math.sqrt(n_samples))

    def resident(a):  # full array, DMA'd once, stays resident across grid steps
        return pl.BlockSpec(a.shape, lambda i: (0,) * a.ndim)

    weights = (enc["w1"], enc["b1"], enc["w2"], enc["b2"], enc["w3"], enc["b3"],
               dec["w1"], dec["b1"], dec["w2"], dec["b2"], dec["w3"], dec["b3"])

    return pl.pallas_call(
        kernel,
        out_shape=(jax.ShapeDtypeStruct((b_pad, code_pad), jnp.float32),
                   jax.ShapeDtypeStruct((b_pad, in_pad), jnp.float32)),
        grid_spec=pltpu.PrefetchScalarGridSpec(
            num_scalar_prefetch=0,
            grid=grid,
            in_specs=[pl.BlockSpec((tm, in_pad), lambda i: (i, 0)),     # x tile
                      pl.BlockSpec((tm, code_pad), lambda i: (i, 0))]   # noise tile
                     + [resident(w) for w in weights],
            out_specs=[pl.BlockSpec((tm, code_pad), lambda i: (i, 0)),  # logits
                       pl.BlockSpec((tm, in_pad), lambda i: (i, 0))],   # reconstruction
        ),
        compiler_params=pltpu.CompilerParams(
            dimension_semantics=("parallel",),        # megacore split on v7x, no-op elsewhere
            vmem_limit_bytes=32 * 1024 * 1024,        # explicit limit, safe on v5e/v6e/v7x
        ),
    )(x_p, noise, *weights)


# ----------------------------------------------------------------------------
# Parameter init: mirrors torch xavier_uniform_(gain=calculate_gain('relu')), zero biases.
# Weights stored as (in, out), zero-padded to lane-dense shapes, cast to bf16.
# ----------------------------------------------------------------------------
def _xavier_relu(key, fan_in, fan_out, in_pad, out_pad):
    gain = math.sqrt(2.0)  # nn.init.calculate_gain('relu')
    bound = gain * math.sqrt(6.0 / (fan_in + fan_out))
    w = jax.random.uniform(key, (fan_in, fan_out), jnp.float32, -bound, bound)
    w_p = jnp.zeros((in_pad, out_pad), jnp.float32).at[:fan_in, :fan_out].set(w)
    b_p = jnp.zeros((1, out_pad), jnp.float32)
    return w_p.astype(jnp.bfloat16), b_p


def make_params(key, input_dim, code_dim):
    in_pad = _round_up(input_dim, 128)
    code_pad = _round_up(code_dim, 128)
    keys = jax.random.split(key, 6)
    enc = {}
    enc["w1"], enc["b1"] = _xavier_relu(keys[0], input_dim, 512, in_pad, 512)
    enc["w2"], enc["b2"] = _xavier_relu(keys[1], 512, 256, 512, 256)
    enc["w3"], enc["b3"] = _xavier_relu(keys[2], 256, code_dim, 256, code_pad)
    dec = {}
    dec["w1"], dec["b1"] = _xavier_relu(keys[3], code_dim, 256, code_pad, 256)
    dec["w2"], dec["b2"] = _xavier_relu(keys[4], 256, 512, 256, 512)
    dec["w3"], dec["b3"] = _xavier_relu(keys[5], 512, input_dim, 512, in_pad)
    return enc, dec


# ----------------------------------------------------------------------------
# Forward
# ----------------------------------------------------------------------------
def _prepare_inputs(x, sample_key, *, in_pad, code_pad, tm_max=128):
    batch, input_dim = x.shape
    tm = min(tm_max, _round_up(batch, 8))          # sublane-aligned batch tile
    b_pad = _round_up(batch, tm)
    x_p = (jnp.zeros((b_pad, in_pad), jnp.bfloat16)
           .at[:batch, :input_dim].set(x.astype(jnp.bfloat16)))
    noise = jax.random.normal(sample_key, (b_pad, code_pad), jnp.float32)
    return x_p, noise, tm


def discrete_vae_forward(params, x, sample_key, *, n, m, n_samples=10, tm_max=128):
    enc, dec = params
    batch, input_dim = x.shape
    code_dim = n * m
    in_pad = enc["w1"].shape[0]
    code_pad = enc["w3"].shape[1]

    x_p, noise, tm = _prepare_inputs(x, sample_key, in_pad=in_pad,
                                     code_pad=code_pad, tm_max=tm_max)
    logits_p, recon_p = _dvae_fused(x_p, noise, enc, dec, tm=tm, n_samples=n_samples)

    # nb_samples == 1 -> the original view/transpose/reshape is an identity.
    logits_2d = logits_p[:batch, :code_dim]
    reconstruction = recon_p[:batch, :input_dim]
    return logits_2d, reconstruction


# Pure-JAX reference with identical padded math (for correctness check).
def _forward_ref(x_p, noise, enc, dec, *, n_samples):
    def dense(a, w, b):
        return jnp.dot(a, w, preferred_element_type=jnp.float32) + b
    h = jnp.maximum(dense(x_p, enc["w1"], enc["b1"]), 0.0).astype(jnp.bfloat16)
    h = jnp.maximum(dense(h, enc["w2"], enc["b2"]), 0.0).astype(jnp.bfloat16)
    logits = dense(h, enc["w3"], enc["b3"])
    code = (logits + noise * (1.0 / math.sqrt(n_samples))).astype(jnp.bfloat16)
    g = jnp.maximum(dense(code, dec["w1"], dec["b1"]), 0.0).astype(jnp.bfloat16)
    g = jnp.maximum(dense(g, dec["w2"], dec["b2"]), 0.0).astype(jnp.bfloat16)
    recon = dense(g, dec["w3"], dec["b3"])
    return logits, recon


if __name__ == "__main__":
    key = jax.random.PRNGKey(0)
    k_param, k_x, k_sample = jax.random.split(key, 3)

    # Small synthetic config consistent with the module's __init__/forward.
    batch, input_dim, n, m = 8, 32, 8, 8        # code_dim = n * m = 64
    code_dim = n * m

    params = make_params(k_param, input_dim, code_dim)
    x = jax.random.normal(k_x, (batch, input_dim), jnp.float32)

    fwd = jax.jit(functools.partial(discrete_vae_forward, n=n, m=m))
    logits_2d, reconstruction = fwd(params, x, k_sample)
    jax.block_until_ready((logits_2d, reconstruction))

    # Shape checks mirroring the torch asserts (nb_samples = 1).
    assert logits_2d.shape == (batch, code_dim)
    assert reconstruction.shape == (batch, input_dim)

    # Numerical check of the fused Pallas kernel vs pure-JAX reference (same bf16 math).
    enc, dec = params
    in_pad = enc["w1"].shape[0]
    code_pad = enc["w3"].shape[1]
    x_p, noise, _ = _prepare_inputs(x, k_sample, in_pad=in_pad, code_pad=code_pad)
    ref_logits_p, ref_recon_p = _forward_ref(x_p, noise, enc, dec, n_samples=10)
    assert jnp.allclose(logits_2d, ref_logits_p[:batch, :code_dim], atol=5e-2, rtol=5e-2)
    assert jnp.allclose(reconstruction, ref_recon_p[:batch, :input_dim], atol=5e-2, rtol=5e-2)

    print("KERNEL_OK")
</pallas_src>

<mosaic_0001>
module attributes {stable_mosaic.version = 11 : i64} {
  func.func @_dvae_fused_kernel(%arg0: i32, %arg1: memref<8x128xbf16, #tpu.memory_space<vmem>>, %arg2: memref<8x128xf32, #tpu.memory_space<vmem>>, %arg3: memref<128x512xbf16, #tpu.memory_space<vmem>>, %arg4: memref<1x512xf32, #tpu.memory_space<vmem>>, %arg5: memref<512x256xbf16, #tpu.memory_space<vmem>>, %arg6: memref<1x256xf32, #tpu.memory_space<vmem>>, %arg7: memref<256x128xbf16, #tpu.memory_space<vmem>>, %arg8: memref<1x128xf32, #tpu.memory_space<vmem>>, %arg9: memref<128x256xbf16, #tpu.memory_space<vmem>>, %arg10: memref<1x256xf32, #tpu.memory_space<vmem>>, %arg11: memref<256x512xbf16, #tpu.memory_space<vmem>>, %arg12: memref<1x512xf32, #tpu.memory_space<vmem>>, %arg13: memref<512x128xbf16, #tpu.memory_space<vmem>>, %arg14: memref<1x128xf32, #tpu.memory_space<vmem>>, %arg15: memref<8x128xf32, #tpu.memory_space<vmem>>, %arg16: memref<8x128xf32, #tpu.memory_space<vmem>>) attributes {dimension_semantics = [#tpu.dimension_semantics<parallel>], iteration_bounds = array<i64: 1>, scalar_prefetch = 0 : i64, scratch_operands = 0 : i64, tpu.core_type = #tpu.core_type<tc>, window_params = [{transform_indices = @transform_0, window_bounds = array<i64: 8, 128>}, {transform_indices = @transform_1, window_bounds = array<i64: 8, 128>}, {pipeline_mode = #tpu.pipeline_mode<synchronous>, transform_indices = @transform_2, window_bounds = array<i64: 128, 512>}, {pipeline_mode = #tpu.pipeline_mode<synchronous>, transform_indices = @transform_3, window_bounds = array<i64: 1, 512>}, {pipeline_mode = #tpu.pipeline_mode<synchronous>, transform_indices = @transform_4, window_bounds = array<i64: 512, 256>}, {pipeline_mode = #tpu.pipeline_mode<synchronous>, transform_indices = @transform_5, window_bounds = array<i64: 1, 256>}, {pipeline_mode = #tpu.pipeline_mode<synchronous>, transform_indices = @transform_6, window_bounds = array<i64: 256, 128>}, {pipeline_mode = #tpu.pipeline_mode<synchronous>, transform_indices = @transform_7, window_bounds = array<i64: 1, 128>}, {pipeline_mode = #tpu.pipeline_mode<synchronous>, transform_indices = @transform_8, window_bounds = array<i64: 128, 256>}, {pipeline_mode = #tpu.pipeline_mode<synchronous>, transform_indices = @transform_9, window_bounds = array<i64: 1, 256>}, {pipeline_mode = #tpu.pipeline_mode<synchronous>, transform_indices = @transform_10, window_bounds = array<i64: 256, 512>}, {pipeline_mode = #tpu.pipeline_mode<synchronous>, transform_indices = @transform_11, window_bounds = array<i64: 1, 512>}, {pipeline_mode = #tpu.pipeline_mode<synchronous>, transform_indices = @transform_12, window_bounds = array<i64: 512, 128>}, {pipeline_mode = #tpu.pipeline_mode<synchronous>, transform_indices = @transform_13, window_bounds = array<i64: 1, 128>}, {transform_indices = @transform_14, window_bounds = array<i64: 8, 128>}, {transform_indices = @transform_15, window_bounds = array<i64: 8, 128>}]} {
    %c0 = arith.constant 0 : index
    %c0_0 = arith.constant 0 : index
    %0 = vector.load %arg1[%c0, %c0_0] : memref<8x128xbf16, #tpu.memory_space<vmem>>, vector<8x128xbf16>
    %c0_1 = arith.constant 0 : index
    %c0_2 = arith.constant 0 : index
    %1 = vector.load %arg3[%c0_1, %c0_2] : memref<128x512xbf16, #tpu.memory_space<vmem>>, vector<128x512xbf16>
    %cst = arith.constant dense<0.000000e+00> : vector<8x512xf32>
    %2 = tpu.matmul %0, %1, %cst {dimension_numbers = #tpu.dot_dimension_numbers<[1], [0], [0], [1], [0, 0, 1, 1], [], []>} : vector<8x128xbf16>, vector<128x512xbf16>, vector<8x512xf32> -> vector<8x512xf32>
    %c0_3 = arith.constant 0 : index
    %c0_4 = arith.constant 0 : index
    %3 = vector.load %arg4[%c0_3, %c0_4] : memref<1x512xf32, #tpu.memory_space<vmem>>, vector<1x512xf32>
    %4 = vector.broadcast %3 : vector<1x512xf32> to vector<8x512xf32>
    %5 = arith.addf %2, %4 : vector<8x512xf32>
    %cst_5 = arith.constant 0.000000e+00 : f32
    %6 = vector.broadcast %cst_5 : f32 to vector<8x512xf32>
    %7 = arith.maximumf %5, %6 : vector<8x512xf32>
    %8 = arith.truncf %7 : vector<8x512xf32> to vector<8x512xbf16>
    %c0_6 = arith.constant 0 : index
    %c0_7 = arith.constant 0 : index
    %9 = vector.load %arg5[%c0_6, %c0_7] : memref<512x256xbf16, #tpu.memory_space<vmem>>, vector<512x256xbf16>
    %cst_8 = arith.constant dense<0.000000e+00> : vector<8x256xf32>
    %10 = tpu.matmul %8, %9, %cst_8 {dimension_numbers = #tpu.dot_dimension_numbers<[1], [0], [0], [1], [0, 0, 1, 1], [], []>} : vector<8x512xbf16>, vector<512x256xbf16>, vector<8x256xf32> -> vector<8x256xf32>
    %c0_9 = arith.constant 0 : index
    %c0_10 = arith.constant 0 : index
    %11 = vector.load %arg6[%c0_9, %c0_10] : memref<1x256xf32, #tpu.memory_space<vmem>>, vector<1x256xf32>
    %12 = vector.broadcast %11 : vector<1x256xf32> to vector<8x256xf32>
    %13 = arith.addf %10, %12 : vector<8x256xf32>
    %cst_11 = arith.constant 0.000000e+00 : f32
    %14 = vector.broadcast %cst_11 : f32 to vector<8x256xf32>
    %15 = arith.maximumf %13, %14 : vector<8x256xf32>
    %16 = arith.truncf %15 : vector<8x256xf32> to vector<8x256xbf16>
    %c0_12 = arith.constant 0 : index
    %c0_13 = arith.constant 0 : index
    %17 = vector.load %arg7[%c0_12, %c0_13] : memref<256x128xbf16, #tpu.memory_space<vmem>>, vector<256x128xbf16>
    %cst_14 = arith.constant dense<0.000000e+00> : vector<8x128xf32>
    %18 = tpu.matmul %16, %17, %cst_14 {dimension_numbers = #tpu.dot_dimension_numbers<[1], [0], [0], [1], [0, 0, 1, 1], [], []>} : vector<8x256xbf16>, vector<256x128xbf16>, vector<8x128xf32> -> vector<8x128xf32>
    %c0_15 = arith.constant 0 : index
    %c0_16 = arith.constant 0 : index
    %19 = vector.load %arg8[%c0_15, %c0_16] : memref<1x128xf32, #tpu.memory_space<vmem>>, vector<1x128xf32>
    %20 = vector.broadcast %19 : vector<1x128xf32> to vector<8x128xf32>
    %21 = arith.addf %18, %20 : vector<8x128xf32>
    %c0_17 = arith.constant 0 : index
    %c0_18 = arith.constant 0 : index
    %22 = vector.load %arg15[%c0_17, %c0_18] : memref<8x128xf32, #tpu.memory_space<vmem>>, vector<8x128xf32>
    tpu.vector_store %arg15[%c0_17, %c0_18], %21 {strides = array<i32>} : memref<8x128xf32, #tpu.memory_space<vmem>>, vector<8x128xf32>,
    %c0_19 = arith.constant 0 : index
    %c0_20 = arith.constant 0 : index
    %23 = vector.load %arg2[%c0_19, %c0_20] : memref<8x128xf32, #tpu.memory_space<vmem>>, vector<8x128xf32>
    %cst_21 = arith.constant 0.316227764 : f32
    %24 = vector.broadcast %cst_21 : f32 to vector<8x128xf32>
    %25 = arith.mulf %23, %24 : vector<8x128xf32>
    %26 = arith.addf %21, %25 : vector<8x128xf32>
    %27 = arith.truncf %26 : vector<8x128xf32> to vector<8x128xbf16>
    %c0_22 = arith.constant 0 : index
    %c0_23 = arith.constant 0 : index
    %28 = vector.load %arg9[%c0_22, %c0_23] : memref<128x256xbf16, #tpu.memory_space<vmem>>, vector<128x256xbf16>
    %cst_24 = arith.constant dense<0.000000e+00> : vector<8x256xf32>
    %29 = tpu.matmul %27, %28, %cst_24 {dimension_numbers = #tpu.dot_dimension_numbers<[1], [0], [0], [1], [0, 0, 1, 1], [], []>} : vector<8x128xbf16>, vector<128x256xbf16>, vector<8x256xf32> -> vector<8x256xf32>
    %c0_25 = arith.constant 0 : index
    %c0_26 = arith.constant 0 : index
    %30 = vector.load %arg10[%c0_25, %c0_26] : memref<1x256xf32, #tpu.memory_space<vmem>>, vector<1x256xf32>
    %31 = vector.broadcast %30 : vector<1x256xf32> to vector<8x256xf32>
    %32 = arith.addf %29, %31 : vector<8x256xf32>
    %cst_27 = arith.constant 0.000000e+00 : f32
    %33 = vector.broadcast %cst_27 : f32 to vector<8x256xf32>
    %34 = arith.maximumf %32, %33 : vector<8x256xf32>
    %35 = arith.truncf %34 : vector<8x256xf32> to vector<8x256xbf16>
    %c0_28 = arith.constant 0 : index
    %c0_29 = arith.constant 0 : index
    %36 = vector.load %arg11[%c0_28, %c0_29] : memref<256x512xbf16, #tpu.memory_space<vmem>>, vector<256x512xbf16>
    %cst_30 = arith.constant dense<0.000000e+00> : vector<8x512xf32>
    %37 = tpu.matmul %35, %36, %cst_30 {dimension_numbers = #tpu.dot_dimension_numbers<[1], [0], [0], [1], [0, 0, 1, 1], [], []>} : vector<8x256xbf16>, vector<256x512xbf16>, vector<8x512xf32> -> vector<8x512xf32>
    %c0_31 = arith.constant 0 : index
    %c0_32 = arith.constant 0 : index
    %38 = vector.load %arg12[%c0_31, %c0_32] : memref<1x512xf32, #tpu.memory_space<vmem>>, vector<1x512xf32>
    %39 = vector.broadcast %38 : vector<1x512xf32> to vector<8x512xf32>
    %40 = arith.addf %37, %39 : vector<8x512xf32>
    %cst_33 = arith.constant 0.000000e+00 : f32
    %41 = vector.broadcast %cst_33 : f32 to vector<8x512xf32>
    %42 = arith.maximumf %40, %41 : vector<8x512xf32>
    %43 = arith.truncf %42 : vector<8x512xf32> to vector<8x512xbf16>
    %c0_34 = arith.constant 0 : index
    %c0_35 = arith.constant 0 : index
    %44 = vector.load %arg13[%c0_34, %c0_35] : memref<512x128xbf16, #tpu.memory_space<vmem>>, vector<512x128xbf16>
    %cst_36 = arith.constant dense<0.000000e+00> : vector<8x128xf32>
    %45 = tpu.matmul %43, %44, %cst_36 {dimension_numbers = #tpu.dot_dimension_numbers<[1], [0], [0], [1], [0, 0, 1, 1], [], []>} : vector<8x512xbf16>, vector<512x128xbf16>, vector<8x128xf32> -> vector<8x128xf32>
    %c0_37 = arith.constant 0 : index
    %c0_38 = arith.constant 0 : index
    %46 = vector.load %arg14[%c0_37, %c0_38] : memref<1x128xf32, #tpu.memory_space<vmem>>, vector<1x128xf32>
    %47 = vector.broadcast %46 : vector<1x128xf32> to vector<8x128xf32>
    %48 = arith.addf %45, %47 : vector<8x128xf32>
    %c0_39 = arith.constant 0 : index
    %c0_40 = arith.constant 0 : index
    %49 = vector.load %arg16[%c0_39, %c0_40] : memref<8x128xf32, #tpu.memory_space<vmem>>, vector<8x128xf32>
    tpu.vector_store %arg16[%c0_39, %c0_40], %48 {strides = array<i32>} : memref<8x128xf32, #tpu.memory_space<vmem>>, vector<8x128xf32>,
    return
  }
  func.func @transform_0(%arg0: i32) -> (i32, i32) {
    %c0_i32 = arith.constant 0 : i32
    %c0_i32_0 = arith.constant 0 : i32
    return %arg0, %c0_i32 : i32, i32
  }
  func.func @transform_1(%arg0: i32) -> (i32, i32) {
    %c0_i32 = arith.constant 0 : i32
    %c0_i32_0 = arith.constant 0 : i32
    return %arg0, %c0_i32 : i32, i32
  }
  func.func @transform_2(%arg0: i32) -> (i32, i32) {
    %c0_i32 = arith.constant 0 : i32
    %c0_i32_0 = arith.constant 0 : i32
    %c0_i32_1 = arith.constant 0 : i32
    return %c0_i32, %c0_i32_0 : i32, i32
  }
  func.func @transform_3(%arg0: i32) -> (i32, i32) {
    %c0_i32 = arith.constant 0 : i32
    %c0_i32_0 = arith.constant 0 : i32
    %c0_i32_1 = arith.constant 0 : i32
    return %c0_i32, %c0_i32_0 : i32, i32
  }
  func.func @transform_4(%arg0: i32) -> (i32, i32) {
    %c0_i32 = arith.constant 0 : i32
    %c0_i32_0 = arith.constant 0 : i32
    %c0_i32_1 = arith.constant 0 : i32
    return %c0_i32, %c0_i32_0 : i32, i32
  }
  func.func @transform_5(%arg0: i32) -> (i32, i32) {
    %c0_i32 = arith.constant 0 : i32
    %c0_i32_0 = arith.constant 0 : i32
    %c0_i32_1 = arith.constant 0 : i32
    return %c0_i32, %c0_i32_0 : i32, i32
  }
  func.func @transform_6(%arg0: i32) -> (i32, i32) {
    %c0_i32 = arith.constant 0 : i32
    %c0_i32_0 = arith.constant 0 : i32
    %c0_i32_1 = arith.constant 0 : i32
    return %c0_i32, %c0_i32_0 : i32, i32
  }
  func.func @transform_7(%arg0: i32) -> (i32, i32) {
    %c0_i32 = arith.constant 0 : i32
    %c0_i32_0 = arith.constant 0 : i32
    %c0_i32_1 = arith.constant 0 : i32
    return %c0_i32, %c0_i32_0 : i32, i32
  }
  func.func @transform_8(%arg0: i32) -> (i32, i32) {
    %c0_i32 = arith.constant 0 : i32
    %c0_i32_0 = arith.constant 0 : i32
    %c0_i32_1 = arith.constant 0 : i32
    return %c0_i32, %c0_i32_0 : i32, i32
  }
  func.func @transform_9(%arg0: i32) -> (i32, i32) {
    %c0_i32 = arith.constant 0 : i32
    %c0_i32_0 = arith.constant 0 : i32
    %c0_i32_1 = arith.constant 0 : i32
    return %c0_i32, %c0_i32_0 : i32, i32
  }
  func.func @transform_10(%arg0: i32) -> (i32, i32) {
    %c0_i32 = arith.constant 0 : i32
    %c0_i32_0 = arith.constant 0 : i32
    %c0_i32_1 = arith.constant 0 : i32
    return %c0_i32, %c0_i32_0 : i32, i32
  }
  func.func @transform_11(%arg0: i32) -> (i32, i32) {
    %c0_i32 = arith.constant 0 : i32
    %c0_i32_0 = arith.constant 0 : i32
    %c0_i32_1 = arith.constant 0 : i32
    return %c0_i32, %c0_i32_0 : i32, i32
  }
  func.func @transform_12(%arg0: i32) -> (i32, i32) {
    %c0_i32 = arith.constant 0 : i32
    %c0_i32_0 = arith.constant 0 : i32
    %c0_i32_1 = arith.constant 0 : i32
    return %c0_i32, %c0_i32_0 : i32, i32
  }
  func.func @transform_13(%arg0: i32) -> (i32, i32) {
    %c0_i32 = arith.constant 0 : i32
    %c0_i32_0 = arith.constant 0 : i32
    %c0_i32_1 = arith.constant 0 : i32
    return %c0_i32, %c0_i32_0 : i32, i32
  }
  func.func @transform_14(%arg0: i32) -> (i32, i32) {
    %c0_i32 = arith.constant 0 : i32
    %c0_i32_0 = arith.constant 0 : i32
    return %arg0, %c0_i32 : i32, i32
  }
  func.func @transform_15(%arg0: i32) -> (i32, i32) {
    %c0_i32 = arith.constant 0 : i32
    %c0_i32_0 = arith.constant 0 : i32
    return %arg0, %c0_i32 : i32, i32
  }
}

</mosaic_0001>

<bundles_post_ra>
// kernel: discrete_vae_forward.1
= control target key start
LH: loop header
LB: loop body
LE: loop exit
PB: predicated region body
PF: predicated region fallthrough
CT: control target
= control target key end

     0   :  { %s3208_s0 = inlined_call_operand.vmem [shape: bf16[8,128], index: 0, kind: input, shape index: {}]   ;;  %s3209_s1 = inlined_call_operand.vmem [shape: f32[8,128], index: 1, kind: input, shape index: {}]   ;;  %s3210_s2 = inlined_call_operand.hbm [shape: bf16[128,512], index: 2, kind: input, shape index: {}]   ;;  %s3211_s3 = inlined_call_operand.vmem [shape: f32[1,512], index: 3, kind: input, shape index: {}]   ;;  %s3212_s4 = inlined_call_operand.hbm [shape: bf16[512,256], index: 4, kind: input, shape index: {}]   ;;  %s3213_s5 = inlined_call_operand.vmem [shape: f32[1,256], index: 5, kind: input, shape index: {}]   ;;  %s3214_s6 = inlined_call_operand.hbm [shape: bf16[256,128], index: 6, kind: input, shape index: {}]   ;;  %s3215_s7 = inlined_call_operand.vmem [shape: f32[1,128], index: 7, kind: input, shape index: {}]   ;;  %s3216_s8 = inlined_call_operand.hbm [shape: bf16[128,256], index: 8, kind: input, shape index: {}]   ;;  %s3217_s9 = inlined_call_operand.vmem [shape: f32[1,256], index: 9, kind: input, shape index: {}]   ;;  %s3218_s10 = inlined_call_operand.hbm [shape: bf16[256,512], index: 10, kind: input, shape index: {}]   ;;  %s3219_s11 = inlined_call_operand.vmem [shape: f32[1,512], index: 11, kind: input, shape index: {}]   ;;  %s3220_s12 = inlined_call_operand.hbm [shape: bf16[512,128], index: 12, kind: input, shape index: {}]   ;;  %s3221_s13 = inlined_call_operand.vmem [shape: f32[1,128], index: 13, kind: input, shape index: {}]   ;;  %s3222_s14 = inlined_call_operand.hbm [shape: f32[8,128], index: 14, kind: output, shape index: {0}]   ;;  %s3223_s15 = inlined_call_operand.hbm [shape: f32[8,128], index: 15, kind: output, shape index: {1}]  }
   0x1   :  { %3225 = sst [smem:[#allocation22_spill]] %s3223_s15 }
   0x2   :  { %21 = vsyncpa [#allocation3], 0 }
   0x3   :  { %22 = vsyncpa [#allocation6], 0 }
   0x4   :  { %23 = vsyncpa [#allocation9], 0 }
   0x5   :  { %24 = vsyncpa [#allocation12], 0 }
   0x6   :  { %25 = vsyncpa [#allocation4], 0 }
   0x7   :  { %26 = vsyncpa [#allocation15], 0  ;;  %s2939_s18 = smov [#allocation5]   ;;  %s2751_s22 = scalar_lea.hbm %s3212_s4, 8192 }
   0x8   :  { %s50_s19 = sshll.u32 %s2939_s18, 4  ;;  %p2752_p0 = scmp.ne.s32.totalorder %s3212_s4, %s2751_s22  ;;  %s51_s19 = int_to_ptr.vmem [resolvable:$true] %s50_s19 }
   0x9   :  { %p2755_p1 = scmp.lt.u32.totalorder %s2751_s22, %s3212_s4 }
   0xb   :  { %p2757_p2 = pnand %p2755_p1, %p2752_p0 }
   0xd   :  { %2760 = shalt.err (!%p2757_p2)
}
   0xe   :  { %s2761_s27 = scalar_lea.vmem %s51_s19, 8192  ;;  %p2766_p4 = scmp.lt.s32.totalorder %s51_s19, %s51_s19 }
   0xf   :  { %p2762_p3 = scmp.ne.s32.totalorder %s51_s19, %s2761_s27  ;;  %p2767_p5 = scmp.lt.s32.totalorder %s2761_s27, %s2761_s27 }
  0x11   :  { %p2768_p6 = por %p2767_p5, %p2766_p4 }
  0x13   :  { %p2769_p7 = pnand %p2768_p6, %p2762_p3 }
  0x15   :  { %2772 = shalt.err (!%p2769_p7)
}
  0x16   :  { %s2940_s28 = smov 128   ;;  %s2941_s29 = smov 8  }
  0x17   :  { %56 = dma.hbm_to_vmem [thread:$0]  %s3212_s4, 8192, %s51_s19, [#allocation6], %s2940_s28, %s2940_s28, %s2941_s29  }
  0x18   :  { %s2942_s17 = smov [#allocation8]   ;;  %s2943_s20 = smov [#allocation2]  }
  0x19   :  { %s78_s18 = sshll.u32 %s2942_s17, 4  ;;  %s36_s21 = sshll.u32 %s2943_s20, 4  ;;  %s79_s18 = int_to_ptr.vmem [resolvable:$true] %s78_s18  ;;  %s37_s21 = int_to_ptr.vmem [resolvable:$true] %s36_s21 }
  0x1a   :  { %s2773_s24 = scalar_lea.hbm %s3216_s8, 2048 }
  0x1b   :  { %p2774_p8 = scmp.ne.s32.totalorder %s3216_s8, %s2773_s24  ;;  %p2777_p9 = scmp.lt.u32.totalorder %s2773_s24, %s3216_s8 }
  0x1d   :  { %p2779_p10 = pnand %p2777_p9, %p2774_p8 }
  0x1f   :  { %2782 = shalt.err (!%p2779_p10)
}
  0x20   :  { %s2783_s4 = scalar_lea.vmem %s79_s18, 2048  ;;  %p2788_p12 = scmp.lt.s32.totalorder %s79_s18, %s79_s18 }
  0x21   :  { %p2784_p11 = scmp.ne.s32.totalorder %s79_s18, %s2783_s4  ;;  %p2789_p13 = scmp.lt.s32.totalorder %s2783_s4, %s2783_s4 }
  0x23   :  { %p2790_p0 = por %p2789_p13, %p2788_p12 }
  0x25   :  { %p2791_p1 = pnand %p2790_p0, %p2784_p11 }
  0x27   :  { %2794 = shalt.err (!%p2791_p1)
}
  0x28   :  { %84 = dma.hbm_to_vmem [thread:$0]  %s3216_s8, 2048, %s79_s18, [#allocation9], %s2940_s28, %s2940_s28, %s2941_s29  }
  0x29   :  { %s2795_s20 = scalar_lea.hbm %s3210_s2, 4096 }
  0x2a   :  { %p2796_p2 = scmp.ne.s32.totalorder %s3210_s2, %s2795_s20  ;;  %p2799_p3 = scmp.lt.u32.totalorder %s2795_s20, %s3210_s2 }
  0x2c   :  { %p2801_p4 = pnand %p2799_p3, %p2796_p2 }
  0x2e   :  { %2804 = shalt.err (!%p2801_p4)
}
  0x2f   :  { %s2805_s25 = scalar_lea.vmem %s37_s21, 4096  ;;  %p2810_p6 = scmp.lt.s32.totalorder %s37_s21, %s37_s21 }
  0x30   :  { %p2806_p5 = scmp.ne.s32.totalorder %s37_s21, %s2805_s25  ;;  %p2811_p7 = scmp.lt.s32.totalorder %s2805_s25, %s2805_s25 }
  0x32   :  { %p2812_p8 = por %p2811_p7, %p2810_p6 }
  0x34   :  { %p2813_p9 = pnand %p2812_p8, %p2806_p5 }
  0x36   :  { %2816 = shalt.err (!%p2813_p9)
}
  0x37   :  { %s2944_s8 = smov 256   ;;  %s2945_s28 = smov 16  }
  0x38   :  { %42 = dma.hbm_to_vmem [thread:$0]  %s3210_s2, 4096, %s37_s21, [#allocation3], %s2944_s8, %s2944_s8, %s2945_s28  }
  0x39   :  { %s2946_s26 = smov [#allocation7]   ;;  %s2817_s30 = scalar_lea.hbm %s3214_s6, 2048 }
  0x3a   :  { %s64_s27 = sshll.u32 %s2946_s26, 4  ;;  %p2818_p10 = scmp.ne.s32.totalorder %s3214_s6, %s2817_s30  ;;  %s65_s27 = int_to_ptr.vmem [resolvable:$true] %s64_s27 }
  0x3b   :  { %p2821_p11 = scmp.lt.u32.totalorder %s2817_s30, %s3214_s6 }
  0x3d   :  { %p2823_p12 = pnand %p2821_p11, %p2818_p10 }
  0x3f   :  { %2826 = shalt.err (!%p2823_p12)
}
  0x40   :  { %s2827_s22 = scalar_lea.vmem %s65_s27, 2048  ;;  %p2832_p0 = scmp.lt.s32.totalorder %s65_s27, %s65_s27 }
  0x41   :  { %p2828_p13 = scmp.ne.s32.totalorder %s65_s27, %s2827_s22  ;;  %p2833_p1 = scmp.lt.s32.totalorder %s2827_s22, %s2827_s22 }
  0x43   :  { %p2834_p2 = por %p2833_p1, %p2832_p0 }
  0x45   :  { %p2835_p3 = pnand %p2834_p2, %p2828_p13 }
  0x47   :  { %2838 = shalt.err (!%p2835_p3)
}
  0x48   :  { %s2947_s2 = smov 64   ;;  %s2948_s21 = smov 4  }
  0x49   :  { %70 = dma.hbm_to_vmem [thread:$0]  %s3214_s6, 2048, %s65_s27, [#allocation6], %s2947_s2, %s2947_s2, %s2948_s21  }
  0x4a   :  { %s2949_s25 = smov [#allocation10]   ;;  %s2950_s18 = smov [#allocation11]  }
  0x4b   :  { %s92_s29 = sshll.u32 %s2949_s25, 4  ;;  %s106_s26 = sshll.u32 %s2950_s18, 4  ;;  %s93_s29 = int_to_ptr.vmem [resolvable:$true] %s92_s29  ;;  %s3088_s26 = int_to_ptr.vmem [resolvable:$true] %s106_s26 }
  0x4c   :  { %s2839_s30 = scalar_lea.hbm %s3218_s10, 8192 }
  0x4d   :  { %p2840_p4 = scmp.ne.s32.totalorder %s3218_s10, %s2839_s30  ;;  %p2843_p5 = scmp.lt.u32.totalorder %s2839_s30, %s3218_s10 }
  0x4f   :  { %p2845_p6 = pnand %p2843_p5, %p2840_p4 }
  0x51   :  { %2848 = shalt.err (!%p2845_p6)
}
  0x52   :  { %s2849_s6 = scalar_lea.vmem %s93_s29, 8192  ;;  %p2854_p8 = scmp.lt.s32.totalorder %s93_s29, %s93_s29 }
  0x53   :  { %p2850_p7 = scmp.ne.s32.totalorder %s93_s29, %s2849_s6  ;;  %p2855_p9 = scmp.lt.s32.totalorder %s2849_s6, %s2849_s6 }
  0x55   :  { %p2856_p10 = por %p2855_p9, %p2854_p8 }
  0x57   :  { %p2857_p11 = pnand %p2856_p10, %p2850_p7 }
  0x59   :  { %2860 = shalt.err (!%p2857_p11)
}
  0x5a   :  { %98 = dma.hbm_to_vmem [thread:$0]  %s3218_s10, 8192, %s93_s29, [#allocation9], %s2944_s8, %s2944_s8, %s2945_s28  }
  0x5b   :  { %s2861_s25 = scalar_lea.hbm %s3220_s12, 4096 }
  0x5c   :  { %p2862_p12 = scmp.ne.s32.totalorder %s3220_s12, %s2861_s25  ;;  %p2865_p13 = scmp.lt.u32.totalorder %s2861_s25, %s3220_s12 }
  0x5e   :  { %p2867_p0 = pnand %p2865_p13, %p2862_p12 }
  0x60   :  { %2870 = shalt.err (!%p2867_p0)
}
  0x61   :  { %s2871_s16 = scalar_lea.vmem %s3088_s26, 4096  ;;  %p2876_p2 = scmp.lt.s32.totalorder %s3088_s26, %s3088_s26 }
  0x62   :  { %p2872_p1 = scmp.ne.s32.totalorder %s3088_s26, %s2871_s16  ;;  %p2877_p3 = scmp.lt.s32.totalorder %s2871_s16, %s2871_s16 }
  0x64   :  { %p2878_p4 = por %p2877_p3, %p2876_p2 }
  0x66   :  { %p2879_p5 = pnand %p2878_p4, %p2872_p1 }
  0x68   :  { %2882 = shalt.err (!%p2879_p5)
}
  0x69   :  { %112 = dma.hbm_to_vmem [thread:$0]  %s3220_s12, 4096, %s3088_s26, [#allocation12], %s2947_s2, %s2947_s2, %s2948_s21  }
  0x6a   :  { %2927 = dma.done.wait [#allocation3], 4096  }
  0x6b   :  { %2928 = vsyncadd [#allocation3], 4294963200 }
  0x6c   :  { %2929 = dma.done.wait [#allocation6], 10240  }
  0x6d   :  { %2930 = vsyncadd [#allocation6], 4294957056 }
  0x6e   :  { %2931 = dma.done.wait [#allocation9], 10240  }
  0x6f   :  { %2932 = vsyncadd [#allocation9], 4294957056 }
  0x70   :  { %2933 = dma.done.wait [#allocation12], 4096  }
  0x71   :  { %2934 = vsyncadd [#allocation12], 4294963200  ;;  %v2951_v0 = vmov 0   ;;  %v2439_v1 = vld [vmem:[#allocation2 + $0x4] ss:$16 sps:$4 sm:$0xff]  }
  0x72   :  { %381 = vmatprep.mubr.bf16.mxu0 %v2951_v0  ;;  %422 = vmatprep.mubr.bf16.mxu1 %v2951_v0  ;;  %v2441_v2 = vld [vmem:[#allocation2] ss:$16 sps:$4 sm:$0xff]   ;;  %v2442_v3 = vld [vmem:[#allocation2 + $0x24] ss:$16 sps:$4 sm:$0xff]   ;;  %v2463_v10 = vld [vmem:[#allocation2 + $0xc] ss:$16 sps:$4 sm:$0xff]  }
  0x73   :  { %349 = vmatprep.subr.bf16.mxu0 %v2439_v1  ;;  %v2444_v4 = vld [vmem:[#allocation2 + $0x20] ss:$16 sps:$4 sm:$0xff]   ;;  %v2445_v5 = vld [vmem:[#allocation2 + $0x44] ss:$16 sps:$4 sm:$0xff]   ;;  %v2465_v11 = vld [vmem:[#allocation2 + $0x8] ss:$16 sps:$4 sm:$0xff]   ;;  %390 = vmatprep.subr.bf16.mxu1 %v2463_v10 }
  0x74   :  { %350 = vmatpush1.bf16.msra.mxu0 %v2441_v2  ;;  %v2447_v6 = vld [vmem:[#allocation2 + $0x40] ss:$16 sps:$4 sm:$0xff]   ;;  %v2448_v7 = vld [vmem:[#allocation2 + $0x64] ss:$16 sps:$4 sm:$0xff]   ;;  %v2466_v12 = vld [vmem:[#allocation2 + $0x2c] ss:$16 sps:$4 sm:$0xff]   ;;  %391 = vmatpush1.bf16.msra.mxu1 %v2465_v11 }
  0x75   :  { %351 = vmatprep.subr.bf16.mxu0 %v2442_v3  ;;  %v2450_v8 = vld [vmem:[#allocation2 + $0x60] ss:$16 sps:$4 sm:$0xff]   ;;  %v2451_v9 = vld [vmem:[#allocation2 + $0x84] ss:$16 sps:$4 sm:$0xff]   ;;  %v2468_v14 = vld [vmem:[#allocation2 + $0x28] ss:$16 sps:$4 sm:$0xff]   ;;  %392 = vmatprep.subr.bf16.mxu1 %v2466_v12 }
  0x76   :  { %v2453_v13 = vld [vmem:[#allocation2 + $0x80] ss:$16 sps:$4 sm:$0xff]   ;;  %v2469_v15 = vld [vmem:[#allocation2 + $0x4c] ss:$16 sps:$4 sm:$0xff]   ;;  %v2454_v16 = vld [vmem:[#allocation2 + $0xa4] ss:$16 sps:$4 sm:$0xff]  }
  0x77   :  { %v2456_v17 = vld [vmem:[#allocation2 + $0xa0] ss:$16 sps:$4 sm:$0xff]   ;;  %v2471_v18 = vld [vmem:[#allocation2 + $0x48] ss:$16 sps:$4 sm:$0xff]   ;;  %v2472_v19 = vld [vmem:[#allocation2 + $0x6c] ss:$16 sps:$4 sm:$0xff]  }
  0x78   :  { %352 = vmatpush1.bf16.msra.mxu0 %v2444_v4  ;;  %393 = vmatpush1.bf16.msra.mxu1 %v2468_v14  ;;  %v2457_v20 = vld [vmem:[#allocation2 + $0xc4] ss:$16 sps:$4 sm:$0xff]   ;;  %v2459_v21 = vld [vmem:[#allocation2 + $0xc0] ss:$16 sps:$4 sm:$0xff]   ;;  %v2474_v22 = vld [vmem:[#allocation2 + $0x68] ss:$16 sps:$4 sm:$0xff]  }
  0x79   :  { %353 = vmatprep.subr.bf16.mxu0 %v2445_v5  ;;  %394 = vmatprep.subr.bf16.mxu1 %v2469_v15  ;;  %v2475_v23 = vld [vmem:[#allocation2 + $0x8c] ss:$16 sps:$4 sm:$0xff]   ;;  %v2460_v24 = vld [vmem:[#allocation2 + $0xe4] ss:$16 sps:$4 sm:$0xff]   ;;  %v2462_v25 = vld [vmem:[#allocation2 + $0xe0] ss:$16 sps:$4 sm:$0xff]  }
  0x7a   :  { %v2477_v26 = vld [vmem:[#allocation2 + $0x88] ss:$16 sps:$4 sm:$0xff]   ;;  %v2478_v27 = vld [vmem:[#allocation2 + $0xac] ss:$16 sps:$4 sm:$0xff]   ;;  %v134_v29 = vld [vmem:[%s3208_s0] sm:$0xf] }
  0x7b   :  { %v2489_v28 = vld [vmem:[#allocation5 + $0x4] ss:$8 sps:$4 sm:$0xff]   ;;  %v2480_v30 = vld [vmem:[#allocation2 + $0xa8] ss:$16 sps:$4 sm:$0xff]   ;;  %v2492_v33 = vld [vmem:[#allocation5 + $0x14] ss:$8 sps:$4 sm:$0xff]  }
  0x7c   :  { %354 = vmatpush1.bf16.msra.mxu0 %v2447_v6  ;;  %395 = vmatpush1.bf16.msra.mxu1 %v2471_v18  ;;  %v2481_v31 = vld [vmem:[#allocation2 + $0xcc] ss:$16 sps:$4 sm:$0xff]   ;;  %v2487_v32 = vld [vmem:[#allocation5] ss:$8 sps:$4 sm:$0xff]   ;;  %v2490_v36 = vld [vmem:[#allocation5 + $0x10] ss:$8 sps:$4 sm:$0xff]  }
  0x7d   :  { %355 = vmatprep.subr.bf16.mxu0 %v2448_v7  ;;  %396 = vmatprep.subr.bf16.mxu1 %v2472_v19  ;;  %v2483_v34 = vld [vmem:[#allocation2 + $0xc8] ss:$16 sps:$4 sm:$0xff]   ;;  %v2484_v35 = vld [vmem:[#allocation2 + $0xec] ss:$16 sps:$4 sm:$0xff]   ;;  %v2583_v4 = vld [vmem:[#allocation7 + $0x40] sm:$0xff]  }
  0x7e   :  { %v2495_v37 = vld [vmem:[#allocation5 + $0x24] ss:$8 sps:$4 sm:$0xff]   ;;  %v2486_v38 = vld [vmem:[#allocation2 + $0xe8] ss:$16 sps:$4 sm:$0xff]   ;;  %v2498_v40 = vld [vmem:[#allocation5 + $0x34] ss:$8 sps:$4 sm:$0xff]  }
  0x7f   :  { %v2493_v39 = vld [vmem:[#allocation5 + $0x20] ss:$8 sps:$4 sm:$0xff]   ;;  %v2496_v41 = vld [vmem:[#allocation5 + $0x30] ss:$8 sps:$4 sm:$0xff]   ;;  %v2501_v42 = vld [vmem:[#allocation5 + $0x44] ss:$8 sps:$4 sm:$0xff]  }
  0x80   :  { %356 = vmatpush1.bf16.msra.mxu0 %v2450_v8  ;;  %397 = vmatpush1.bf16.msra.mxu1 %v2474_v22  ;;  %v2499_v43 = vld [vmem:[#allocation5 + $0x40] ss:$8 sps:$4 sm:$0xff]   ;;  %v2504_v44 = vld [vmem:[#allocation5 + $0x54] ss:$8 sps:$4 sm:$0xff]   ;;  %v2502_v45 = vld [vmem:[#allocation5 + $0x50] ss:$8 sps:$4 sm:$0xff]  }
  0x81   :  { %357 = vmatprep.subr.bf16.mxu0 %v2451_v9  ;;  %398 = vmatprep.subr.bf16.mxu1 %v2475_v23  ;;  %v2507_v46 = vld [vmem:[#allocation5 + $0x64] ss:$8 sps:$4 sm:$0xff]   ;;  %v2505_v47 = vld [vmem:[#allocation5 + $0x60] ss:$8 sps:$4 sm:$0xff]   ;;  %v2510_v48 = vld [vmem:[#allocation5 + $0x74] ss:$8 sps:$4 sm:$0xff]  }
  0x82   :  { %v2508_v49 = vld [vmem:[#allocation5 + $0x70] ss:$8 sps:$4 sm:$0xff]   ;;  %v2513_v50 = vld [vmem:[#allocation5 + $0x84] ss:$8 sps:$4 sm:$0xff]   ;;  %v2511_v51 = vld [vmem:[#allocation5 + $0x80] ss:$8 sps:$4 sm:$0xff]  }
  0x83   :  { %v2516_v52 = vld [vmem:[#allocation5 + $0x94] ss:$8 sps:$4 sm:$0xff]   ;;  %v2514_v53 = vld [vmem:[#allocation5 + $0x90] ss:$8 sps:$4 sm:$0xff]   ;;  %v2519_v54 = vld [vmem:[#allocation5 + $0xa4] ss:$8 sps:$4 sm:$0xff]  }
  0x84   :  { %358 = vmatpush1.bf16.msra.mxu0 %v2453_v13  ;;  %399 = vmatpush1.bf16.msra.mxu1 %v2477_v26  ;;  %v2517_v55 = vld [vmem:[#allocation5 + $0xa0] ss:$8 sps:$4 sm:$0xff]   ;;  %v2522_v56 = vld [vmem:[#allocation5 + $0xb4] ss:$8 sps:$4 sm:$0xff]   ;;  %v2520_v57 = vld [vmem:[#allocation5 + $0xb0] ss:$8 sps:$4 sm:$0xff]  }
  0x85   :  { %359 = vmatprep.subr.bf16.mxu0 %v2454_v16  ;;  %400 = vmatprep.subr.bf16.mxu1 %v2478_v27  ;;  %v2525_v58 = vld [vmem:[#allocation5 + $0xc4] ss:$8 sps:$4 sm:$0xff]   ;;  %v2523_v59 = vld [vmem:[#allocation5 + $0xc0] ss:$8 sps:$4 sm:$0xff]   ;;  %v2528_v60 = vld [vmem:[#allocation5 + $0xd4] ss:$8 sps:$4 sm:$0xff]   ;;  %v169_v16 = vlaneseq }
  0x86   :  { %v2526_v61 = vld [vmem:[#allocation5 + $0xd0] ss:$8 sps:$4 sm:$0xff]   ;;  %v2531_v62 = vld [vmem:[#allocation5 + $0xe4] ss:$8 sps:$4 sm:$0xff]   ;;  %v2529_v63 = vld [vmem:[#allocation5 + $0xe0] ss:$8 sps:$4 sm:$0xff]  }
  0x87   :  { %v2534_v1 = vld [vmem:[#allocation5 + $0xf4] ss:$8 sps:$4 sm:$0xff]   ;;  %v2532_v2 = vld [vmem:[#allocation5 + $0xf0] ss:$8 sps:$4 sm:$0xff]   ;;  %v2537_v3 = vld [vmem:[#allocation5 + $0x104] ss:$8 sps:$4 sm:$0xff]  }
  0x88   :  { %360 = vmatpush1.bf16.msra.mxu0 %v2456_v17  ;;  %401 = vmatpush1.bf16.msra.mxu1 %v2480_v30  ;;  %v2584_v5 = vld [vmem:[#allocation7] sm:$0xff]   ;;  %v2585_v6 = vld [vmem:[#allocation7 + $0x48] sm:$0xff]   ;;  %v2587_v8 = vld [vmem:[#allocation7 + $0x50] sm:$0xff]   ;;  %v3130_v17 = vshrl.u32 %v169_v16, 7 }
  0x89   :  { %361 = vmatprep.subr.bf16.mxu0 %v2457_v20  ;;  %402 = vmatprep.subr.bf16.mxu1 %v2481_v31  ;;  %v2586_v7 = vld [vmem:[#allocation7 + $0x8] sm:$0xff]   ;;  %v2588_v9 = vld [vmem:[#allocation7 + $0x10] sm:$0xff]   ;;  %v2589_v10 = vld [vmem:[#allocation7 + $0x58] sm:$0xff]  }
  0x8a   :  { %v2590_v11 = vld [vmem:[#allocation7 + $0x18] sm:$0xff]   ;;  %v2591_v12 = vld [vmem:[#allocation7 + $0x60] sm:$0xff]   ;;  %v2593_v14 = vld [vmem:[#allocation7 + $0x68] sm:$0xff]   ;;  %v3133_v18 = vsub.s32 0, %v3130_v17  ;;  %v3141_v20 = vsub.s32 1, %v3130_v17  ;;  %v183_v31 = vsub.s32 3, %v3130_v17 }
  0x8b   :  { %v2592_v13 = vld [vmem:[#allocation7 + $0x20] sm:$0xff]   ;;  %v2594_v15 = vld [vmem:[#allocation7 + $0x28] sm:$0xff]   ;;  %v2596_v16 = vld [vmem:[#allocation7 + $0x30] sm:$0xff]  }
  0x8c   :  { %362 = vmatpush1.bf16.msra.mxu0 %v2459_v21  ;;  %403 = vmatpush1.bf16.msra.mxu1 %v2483_v34  ;;  %v3138_v19 = vld [vmem:[%s3211_s3] sm:$0xf] }
  0x8d   :  { %363 = vmatprep.subr.bf16.mxu0 %v2460_v24  ;;  %404 = vmatprep.subr.bf16.mxu1 %v2484_v35  ;;  %v172_v21 = vrot.slane %v3138_v19, %v3133_v18  ;;  %v176_v22 = vrot.slane %v3138_v19, %v3141_v20  ;;  %v2540_v35 = vld [vmem:[#allocation5 + $0x114] ss:$8 sps:$4 sm:$0xff]  }
  0x90   :  { %364 = vmatpush1.bf16.msra.mxu0 %v2462_v25  ;;  %405 = vmatpush1.bf16.msra.mxu1 %v2486_v38  ;;  %v2543_v38 = vld [vmem:[#allocation5 + $0x124] ss:$8 sps:$4 sm:$0xff]  }
  0x91   :  { %835 = vmatprep.subr.bf16.mxu0 %v2489_v28  ;;  %2352 = vmatprep.subr.bf16.mxu1 %v2583_v4  ;;  %v179_v4 = vsub.s32 2, %v3130_v17 }
  0x93   :  { %382 = vmatmul.mubr.bf16.vlgmr.msra.gmra.mrb[0].mxu0 %v134_v29  ;;  %423 = vmatmul.mubr.bf16.vlgmr.msra.gmra.mrb[0].mxu1 %v134_v29 }
  0x94   :  { %836 = vmatpush1.bf16.msra.mxu0 %v2487_v32  ;;  %2353 = vmatpush3.bf16.msra.mxu1 %v2584_v5  ;;  %v2576_v5 = vld [vmem:[#allocation5 + $0x1d4] ss:$8 sps:$4 sm:$0xff]  }
  0x95   :  { %837 = vmatprep.subr.bf16.mxu0 %v2492_v33  ;;  %2354 = vmatprep.subr.bf16.mxu1 %v2585_v6  ;;  %v2535_v33 = vld [vmem:[#allocation5 + $0x100] ss:$8 sps:$4 sm:$0xff]   ;;  %v2574_v6 = vld [vmem:[#allocation5 + $0x1d0] ss:$8 sps:$4 sm:$0xff]  }
  0x98   :  { %838 = vmatpush1.bf16.msra.mxu0 %v2490_v36  ;;  %2355 = vmatpush3.bf16.msra.mxu1 %v2586_v7  ;;  %v184_v36 = vrot.slane %v3138_v19, %v183_v31  ;;  %v180_v7 = vrot.slane %v3138_v19, %v179_v4  ;;  %v2598_v19 = vld [vmem:[#allocation7 + $0x38] sm:$0xff]  }
  0x99   :  { %839 = vmatprep.subr.bf16.mxu0 %v2495_v37  ;;  %2356 = vmatprep.subr.bf16.mxu1 %v2587_v8  ;;  %v2538_v37 = vld [vmem:[#allocation5 + $0x110] ss:$8 sps:$4 sm:$0xff]   ;;  %v2579_v8 = vld [vmem:[#allocation5 + $0x1e4] ss:$8 sps:$4 sm:$0xff]  }
  0x9c   :  { %840 = vmatpush1.bf16.msra.mxu0 %v2493_v39  ;;  %2357 = vmatpush3.bf16.msra.mxu1 %v2588_v9  ;;  %v2577_v9 = vld [vmem:[#allocation5 + $0x1e0] ss:$8 sps:$4 sm:$0xff]  }
  0x9d   :  { %841 = vmatprep.subr.bf16.mxu0 %v2498_v40  ;;  %2358 = vmatprep.subr.bf16.mxu1 %v2589_v10 }
  0xa0   :  { %842 = vmatpush1.bf16.msra.mxu0 %v2496_v41  ;;  %2359 = vmatpush3.bf16.msra.mxu1 %v2590_v11  ;;  %v2582_v11 = vld [vmem:[#allocation5 + $0x1f4] ss:$8 sps:$4 sm:$0xff]  }
  0xa1   :  { %843 = vmatprep.subr.bf16.mxu0 %v2501_v42  ;;  %2360 = vmatprep.subr.bf16.mxu1 %v2591_v12  ;;  %v2580_v12 = vld [vmem:[#allocation5 + $0x1f0] ss:$8 sps:$4 sm:$0xff]  }
  0xa4   :  { %844 = vmatpush1.bf16.msra.mxu0 %v2499_v43  ;;  %2361 = vmatpush3.bf16.msra.mxu1 %v2592_v13  ;;  %v2541_v43 = vld [vmem:[#allocation5 + $0x120] ss:$8 sps:$4 sm:$0xff]  }
  0xa5   :  { %845 = vmatprep.subr.bf16.mxu0 %v2504_v44  ;;  %2362 = vmatprep.subr.bf16.mxu1 %v2593_v14 }
  0xa8   :  { %846 = vmatpush1.bf16.msra.mxu0 %v2502_v45  ;;  %2363 = vmatpush3.bf16.msra.mxu1 %v2594_v15  ;;  %v2546_v45 = vld [vmem:[#allocation5 + $0x134] ss:$8 sps:$4 sm:$0xff]  }
  0xa9   :  { %847 = vmatprep.subr.bf16.mxu0 %v2507_v46  ;;  %v2595_v15 = vld [vmem:[#allocation7 + $0x70] sm:$0xff]  }
  0xaa   :  { %2364 = vmatprep.subr.bf16.mxu1 %v2595_v15  ;;  %v2698_v15 = vld [vmem:[#allocation10 + $0x188] ss:$16 sps:$4 sm:$0xff]  }
  0xac   :  { %848 = vmatpush1.bf16.msra.mxu0 %v2505_v47  ;;  %2365 = vmatpush3.bf16.msra.mxu1 %v2596_v16  ;;  %v2706_v16 = vld [vmem:[#allocation10 + $0x1ac] ss:$16 sps:$4 sm:$0xff]  }
  0xad   :  { %849 = vmatprep.subr.bf16.mxu0 %v2510_v48  ;;  %v2544_v48 = vld [vmem:[#allocation5 + $0x130] ss:$8 sps:$4 sm:$0xff]  }
  0xb0   :  { %850 = vmatpush1.bf16.msra.mxu0 %v2508_v49  ;;  %v2549_v49 = vld [vmem:[#allocation5 + $0x144] ss:$8 sps:$4 sm:$0xff]  }
  0xb1   :  { %851 = vmatprep.subr.bf16.mxu0 %v2513_v50  ;;  %v2547_v50 = vld [vmem:[#allocation5 + $0x140] ss:$8 sps:$4 sm:$0xff]  }
  0xb4   :  { %852 = vmatpush1.bf16.msra.mxu0 %v2511_v51  ;;  %v2552_v51 = vld [vmem:[#allocation5 + $0x154] ss:$8 sps:$4 sm:$0xff]  }
  0xb5   :  { %853 = vmatprep.subr.bf16.mxu0 %v2516_v52  ;;  %v2550_v52 = vld [vmem:[#allocation5 + $0x150] ss:$8 sps:$4 sm:$0xff]  }
  0xb8   :  { %854 = vmatpush1.bf16.msra.mxu0 %v2514_v53  ;;  %v2555_v53 = vld [vmem:[#allocation5 + $0x164] ss:$8 sps:$4 sm:$0xff]  }
  0xb9   :  { %855 = vmatprep.subr.bf16.mxu0 %v2519_v54  ;;  %v2553_v54 = vld [vmem:[#allocation5 + $0x160] ss:$8 sps:$4 sm:$0xff]  }
  0xbc   :  { %856 = vmatpush1.bf16.msra.mxu0 %v2517_v55  ;;  %v2558_v55 = vld [vmem:[#allocation5 + $0x174] ss:$8 sps:$4 sm:$0xff]  }
  0xbd   :  { %857 = vmatprep.subr.bf16.mxu0 %v2522_v56  ;;  %v2556_v56 = vld [vmem:[#allocation5 + $0x170] ss:$8 sps:$4 sm:$0xff]  }
  0xc0   :  { %858 = vmatpush1.bf16.msra.mxu0 %v2520_v57  ;;  %v2561_v57 = vld [vmem:[#allocation5 + $0x184] ss:$8 sps:$4 sm:$0xff]  }
  0xc1   :  { %859 = vmatprep.subr.bf16.mxu0 %v2525_v58  ;;  %v2559_v58 = vld [vmem:[#allocation5 + $0x180] ss:$8 sps:$4 sm:$0xff]  }
  0xc4   :  { %860 = vmatpush1.bf16.msra.mxu0 %v2523_v59  ;;  %v2564_v59 = vld [vmem:[#allocation5 + $0x194] ss:$8 sps:$4 sm:$0xff]  }
  0xc5   :  { %861 = vmatprep.subr.bf16.mxu0 %v2528_v60  ;;  %v2562_v60 = vld [vmem:[#allocation5 + $0x190] ss:$8 sps:$4 sm:$0xff]  }
  0xc8   :  { %862 = vmatpush1.bf16.msra.mxu0 %v2526_v61  ;;  %v2567_v61 = vld [vmem:[#allocation5 + $0x1a4] ss:$8 sps:$4 sm:$0xff]  }
  0xc9   :  { %863 = vmatprep.subr.bf16.mxu0 %v2531_v62  ;;  %v2565_v62 = vld [vmem:[#allocation5 + $0x1a0] ss:$8 sps:$4 sm:$0xff]  }
  0xcc   :  { %864 = vmatpush1.bf16.msra.mxu0 %v2529_v63  ;;  %v2570_v63 = vld [vmem:[#allocation5 + $0x1b4] ss:$8 sps:$4 sm:$0xff]  }
  0xcd   :  { %865 = vmatprep.subr.bf16.mxu0 %v2534_v1  ;;  %v2568_v1 = vld [vmem:[#allocation5 + $0x1b0] ss:$8 sps:$4 sm:$0xff]  }
  0xd0   :  { %866 = vmatpush1.bf16.msra.mxu0 %v2532_v2  ;;  %v2573_v2 = vld [vmem:[#allocation5 + $0x1c4] ss:$8 sps:$4 sm:$0xff]  }
  0xd1   :  { %876 = vmatprep.subr.bf16.mxu0 %v2537_v3  ;;  %v2571_v3 = vld [vmem:[#allocation5 + $0x1c0] ss:$8 sps:$4 sm:$0xff]  }
 0x166   :  { %v383_v23 = vpop.f32.mrb[0].mxu0  ;;  %v424_v39 = vpop.f32.mrb[0].mxu1 }
 0x167   :  { %v384_v24 = vadd.f32 %v383_v23, %v172_v21  ;;  %v385_v25 = vpop.f32.mrb[1].mxu0  ;;  %v426_v40 = vpop.f32.mrb[1].mxu1  ;;  %v425_v10 = vadd.f32 %v424_v39, %v180_v7  ;;  %v2597_v21 = vld [vmem:[#allocation7 + $0x78] sm:$0xff]   ;;  %v503_v23 = vld [vmem:[%s3213_s5] sm:$0x3] }
 0x168   :  { %v386_v26 = vadd.f32 %v385_v25, %v176_v22  ;;  %v387_v27 = vpop.f32.mrb[2].mxu0  ;;  %v427_v41 = vadd.f32 %v426_v40, %v184_v36  ;;  %v428_v42 = vpop.f32.mrb[2].mxu1  ;;  %2366 = vmatprep.subr.bf16.mxu1 %v2597_v21  ;;  %v2601_v22 = vld [vmem:[#allocation8 + $0x4] ss:$8 sps:$4 sm:$0xff]   ;;  %v512_v25 = vrot.slane %v503_v23, %v3141_v20  ;;  %v2599_v36 = vld [vmem:[#allocation8] ss:$8 sps:$4 sm:$0xff]  }
 0x169   :  { %v431_v28 = vmax.f32 %v384_v24, 0.0  ;;  %v388_v29 = vpop.f32.mrb[3].mxu0  ;;  %v429_v44 = vpop.f32.mrb[3].mxu1  ;;  %v433_v13 = vmax.f32 %v425_v10, 0.0  ;;  %2367 = vmatpush3.bf16.msra.mxu1 %v2598_v19  ;;  %v508_v24 = vrot.slane %v503_v23, %v3133_v18  ;;  %v2602_v39 = vld [vmem:[#allocation8 + $0x10] ss:$8 sps:$4 sm:$0xff]  }
 0x16a   :  { %v432_v30 = vmax.f32 %v386_v26, 0.0  ;;  %v434_v46 = vmax.f32 %v427_v41, 0.0  ;;  %1209 = vmatprep.subr.bf16.mxu1 %v2601_v22  ;;  %v2607_v40 = vld [vmem:[#allocation8 + $0x24] ss:$8 sps:$4 sm:$0xff]   ;;  %v2605_v41 = vld [vmem:[#allocation8 + $0x20] ss:$8 sps:$4 sm:$0xff]  }
 0x16b   :  { %v435_v34 = vpack.c.bf16 %v431_v28, %v431_v28  ;;  %v437_v14 = vpack.c.bf16 %v433_v13, %v433_v13  ;;  %v2610_v42 = vld [vmem:[#allocation8 + $0x34] ss:$8 sps:$4 sm:$0xff]   ;;  %v2613_v44 = vld [vmem:[#allocation8 + $0x44] ss:$8 sps:$4 sm:$0xff]   ;;  %v2674_v7 = vld [vmem:[#allocation10 + $0x108] ss:$16 sps:$4 sm:$0xff]  }
 0x16c   :  { %v436_v32 = vpack.c.bf16 %v432_v30, %v432_v30  ;;  %v438_v47 = vpack.c.bf16 %v434_v46, %v434_v46  ;;  %v2616_v46 = vld [vmem:[#allocation8 + $0x54] ss:$8 sps:$4 sm:$0xff]   ;;  %v2692_v13 = vld [vmem:[#allocation10 + $0x168] ss:$16 sps:$4 sm:$0xff]   ;;  %v1097_v19 = vld [vmem:[%s3209_s1] sm:$0xff] }
 0x16d   :  { %v2688_v10 = vld [vmem:[#allocation10 + $0x14c] ss:$16 sps:$4 sm:$0xff]   ;;  %v2704_v21 = vld [vmem:[#allocation10 + $0x1a8] ss:$16 sps:$4 sm:$0xff]   ;;  %v2222_v23 = vld [vmem:[%s3215_s7] ss:$0 sm:$0xff] }
 0x16e   :  { %867 = vmatprep.mubr.bf16.mxu0 %v436_v32 }
 0x16f   :  { %868 = vmatmul.mubr.bf16.vlgmr.msra.gmra.mrb[4].mxu0 %v435_v34 }
 0x170   :  { %877 = vmatpush1.bf16.msra.mxu0 %v2535_v33  ;;  %908 = vmatprep.mubr.bf16.mxu0 %v438_v47  ;;  %v2614_v47 = vld [vmem:[#allocation8 + $0x50] ss:$8 sps:$4 sm:$0xff]  }
 0x171   :  { %878 = vmatprep.subr.bf16.mxu0 %v2540_v35 }
 0x174   :  { %879 = vmatpush1.bf16.msra.mxu0 %v2538_v37 }
 0x175   :  { %880 = vmatprep.subr.bf16.mxu0 %v2543_v38  ;;  %v2604_v38 = vld [vmem:[#allocation8 + $0x14] ss:$8 sps:$4 sm:$0xff]  }
 0x178   :  { %881 = vmatpush1.bf16.msra.mxu0 %v2541_v43  ;;  %v2608_v43 = vld [vmem:[#allocation8 + $0x30] ss:$8 sps:$4 sm:$0xff]  }
 0x179   :  { %882 = vmatprep.subr.bf16.mxu0 %v2546_v45  ;;  %v2611_v45 = vld [vmem:[#allocation8 + $0x40] ss:$8 sps:$4 sm:$0xff]  }
 0x17c   :  { %883 = vmatpush1.bf16.msra.mxu0 %v2544_v48  ;;  %v2619_v48 = vld [vmem:[#allocation8 + $0x64] ss:$8 sps:$4 sm:$0xff]  }
 0x17d   :  { %884 = vmatprep.subr.bf16.mxu0 %v2549_v49  ;;  %v2622_v49 = vld [vmem:[#allocation8 + $0x74] ss:$8 sps:$4 sm:$0xff]  }
 0x180   :  { %885 = vmatpush1.bf16.msra.mxu0 %v2547_v50  ;;  %v2620_v50 = vld [vmem:[#allocation8 + $0x70] ss:$8 sps:$4 sm:$0xff]  }
 0x181   :  { %886 = vmatprep.subr.bf16.mxu0 %v2552_v51  ;;  %v2625_v51 = vld [vmem:[#allocation10 + $0x4] ss:$16 sps:$4 sm:$0xff]  }
 0x184   :  { %887 = vmatpush1.bf16.msra.mxu0 %v2550_v52  ;;  %v2626_v52 = vld [vmem:[#allocation10 + $0x8] ss:$16 sps:$4 sm:$0xff]  }
 0x185   :  { %888 = vmatprep.subr.bf16.mxu0 %v2555_v53  ;;  %v2628_v53 = vld [vmem:[#allocation10 + $0xc] ss:$16 sps:$4 sm:$0xff]  }
 0x188   :  { %889 = vmatpush1.bf16.msra.mxu0 %v2553_v54  ;;  %v2634_v54 = vld [vmem:[#allocation10 + $0x2c] ss:$16 sps:$4 sm:$0xff]  }
 0x189   :  { %890 = vmatprep.subr.bf16.mxu0 %v2558_v55  ;;  %v2632_v55 = vld [vmem:[#allocation10 + $0x28] ss:$16 sps:$4 sm:$0xff]  }
 0x18c   :  { %891 = vmatpush1.bf16.msra.mxu0 %v2556_v56  ;;  %v2640_v56 = vld [vmem:[#allocation10 + $0x4c] ss:$16 sps:$4 sm:$0xff]  }
 0x18d   :  { %892 = vmatprep.subr.bf16.mxu0 %v2561_v57  ;;  %v2638_v57 = vld [vmem:[#allocation10 + $0x48] ss:$16 sps:$4 sm:$0xff]  }
 0x190   :  { %893 = vmatpush1.bf16.msra.mxu0 %v2559_v58  ;;  %v2646_v58 = vld [vmem:[#allocation10 + $0x6c] ss:$16 sps:$4 sm:$0xff]  }
 0x191   :  { %894 = vmatprep.subr.bf16.mxu0 %v2564_v59  ;;  %v2644_v59 = vld [vmem:[#allocation10 + $0x68] ss:$16 sps:$4 sm:$0xff]  }
 0x194   :  { %895 = vmatpush1.bf16.msra.mxu0 %v2562_v60  ;;  %v2652_v60 = vld [vmem:[#allocation10 + $0x8c] ss:$16 sps:$4 sm:$0xff]  }
 0x195   :  { %896 = vmatprep.subr.bf16.mxu0 %v2567_v61  ;;  %v2650_v61 = vld [vmem:[#allocation10 + $0x88] ss:$16 sps:$4 sm:$0xff]  }
 0x198   :  { %897 = vmatpush1.bf16.msra.mxu0 %v2565_v62  ;;  %v2658_v62 = vld [vmem:[#allocation10 + $0xac] ss:$16 sps:$4 sm:$0xff]  }
 0x199   :  { %898 = vmatprep.subr.bf16.mxu0 %v2570_v63  ;;  %v2656_v63 = vld [vmem:[#allocation10 + $0xa8] ss:$16 sps:$4 sm:$0xff]  }
 0x19c   :  { %899 = vmatpush1.bf16.msra.mxu0 %v2568_v1  ;;  %v2664_v1 = vld [vmem:[#allocation10 + $0xcc] ss:$16 sps:$4 sm:$0xff]  }
 0x19d   :  { %900 = vmatprep.subr.bf16.mxu0 %v2573_v2  ;;  %v2662_v2 = vld [vmem:[#allocation10 + $0xc8] ss:$16 sps:$4 sm:$0xff]  }
 0x1a0   :  { %901 = vmatpush1.bf16.msra.mxu0 %v2571_v3  ;;  %v2670_v3 = vld [vmem:[#allocation10 + $0xec] ss:$16 sps:$4 sm:$0xff]  }
 0x1a1   :  { %902 = vmatprep.subr.bf16.mxu0 %v2576_v5  ;;  %v2668_v5 = vld [vmem:[#allocation10 + $0xe8] ss:$16 sps:$4 sm:$0xff]  }
 0x1a4   :  { %903 = vmatpush1.bf16.msra.mxu0 %v2574_v6  ;;  %v2676_v6 = vld [vmem:[#allocation10 + $0x10c] ss:$16 sps:$4 sm:$0xff]  }
 0x1a5   :  { %904 = vmatprep.subr.bf16.mxu0 %v2579_v8  ;;  %v2682_v8 = vld [vmem:[#allocation10 + $0x12c] ss:$16 sps:$4 sm:$0xff]  }
 0x1a8   :  { %905 = vmatpush1.bf16.msra.mxu0 %v2577_v9  ;;  %v2680_v9 = vld [vmem:[#allocation10 + $0x128] ss:$16 sps:$4 sm:$0xff]  }
 0x1a9   :  { %906 = vmatprep.subr.bf16.mxu0 %v2582_v11  ;;  %v2686_v11 = vld [vmem:[#allocation10 + $0x148] ss:$16 sps:$4 sm:$0xff]  }
 0x1ac   :  { %907 = vmatpush1.bf16.msra.mxu0 %v2580_v12  ;;  %v2694_v12 = vld [vmem:[#allocation10 + $0x16c] ss:$16 sps:$4 sm:$0xff]  }
 0x1ad   :  { %1701 = vmatprep.subr.bf16.mxu0 %v2628_v53  ;;  %v2691_v53 = vld [vmem:[#allocation10 + $0x164] ss:$16 sps:$4 sm:$0xff]  }
 0x1af   :  { %909 = vmatmul.mubr.bf16.vlgmr.msra.gmra.mrb[4].mxu0 %v437_v14  ;;  %v2700_v14 = vld [vmem:[#allocation10 + $0x18c] ss:$16 sps:$4 sm:$0xff]  }
 0x1b0   :  { %1702 = vmatpush1.bf16.msra.mxu0 %v2626_v52  ;;  %v2683_v52 = vld [vmem:[#allocation10 + $0x140] ss:$16 sps:$4 sm:$0xff]  }
 0x1b1   :  { %1703 = vmatprep.subr.bf16.mxu0 %v2634_v54  ;;  %v2689_v54 = vld [vmem:[#allocation10 + $0x160] ss:$16 sps:$4 sm:$0xff]  }
 0x1b4   :  { %1704 = vmatpush1.bf16.msra.mxu0 %v2632_v55  ;;  %v2697_v55 = vld [vmem:[#allocation10 + $0x184] ss:$16 sps:$4 sm:$0xff]  }
 0x1b5   :  { %1705 = vmatprep.subr.bf16.mxu0 %v2640_v56  ;;  %v2695_v56 = vld [vmem:[#allocation10 + $0x180] ss:$16 sps:$4 sm:$0xff]  }
 0x1b8   :  { %1706 = vmatpush1.bf16.msra.mxu0 %v2638_v57  ;;  %v2703_v57 = vld [vmem:[#allocation10 + $0x1a4] ss:$16 sps:$4 sm:$0xff]  }
 0x1b9   :  { %1707 = vmatprep.subr.bf16.mxu0 %v2646_v58  ;;  %v2701_v58 = vld [vmem:[#allocation10 + $0x1a0] ss:$16 sps:$4 sm:$0xff]  }
 0x1bc   :  { %1708 = vmatpush1.bf16.msra.mxu0 %v2644_v59  ;;  %v2709_v59 = vld [vmem:[#allocation10 + $0x1c4] ss:$16 sps:$4 sm:$0xff]  }
 0x1bd   :  { %1709 = vmatprep.subr.bf16.mxu0 %v2652_v60  ;;  %v2712_v60 = vld [vmem:[#allocation10 + $0x1cc] ss:$16 sps:$4 sm:$0xff]  }
 0x1c0   :  { %1710 = vmatpush1.bf16.msra.mxu0 %v2650_v61  ;;  %v2707_v61 = vld [vmem:[#allocation10 + $0x1c0] ss:$16 sps:$4 sm:$0xff]  }
 0x1c1   :  { %1711 = vmatprep.subr.bf16.mxu0 %v2658_v62  ;;  %v2710_v62 = vld [vmem:[#allocation10 + $0x1c8] ss:$16 sps:$4 sm:$0xff]  }
 0x1c4   :  { %1712 = vmatpush1.bf16.msra.mxu0 %v2656_v63  ;;  %v2715_v63 = vld [vmem:[#allocation10 + $0x1e4] ss:$16 sps:$4 sm:$0xff]  }
 0x1c5   :  { %1713 = vmatprep.subr.bf16.mxu0 %v2664_v1  ;;  %v2718_v1 = vld [vmem:[#allocation10 + $0x1ec] ss:$16 sps:$4 sm:$0xff]  }
 0x1c8   :  { %1714 = vmatpush1.bf16.msra.mxu0 %v2662_v2  ;;  %v2713_v2 = vld [vmem:[#allocation10 + $0x1e0] ss:$16 sps:$4 sm:$0xff]  }
 0x1c9   :  { %1715 = vmatprep.subr.bf16.mxu0 %v2670_v3  ;;  %v2716_v3 = vld [vmem:[#allocation10 + $0x1e8] ss:$16 sps:$4 sm:$0xff]  }
 0x1cc   :  { %1716 = vmatpush1.bf16.msra.mxu0 %v2668_v5  ;;  %v2719_v5 = vld [vmem:[#allocation11 + $0x40] sm:$0xff]  }
 0x1cd   :  { %1717 = vmatprep.subr.bf16.mxu0 %v2676_v6  ;;  %v1117_v6 = vld [vmem:[%s3217_s9] sm:$0x3] }
 0x1d0   :  { %1718 = vmatpush1.bf16.msra.mxu0 %v2674_v7  ;;  %v1122_v7 = vrot.slane %v1117_v6, %v3133_v18 }
 0x1d1   :  { %1719 = vmatprep.subr.bf16.mxu0 %v2682_v8  ;;  %v1126_v8 = vrot.slane %v1117_v6, %v3141_v20  ;;  %v2747_v6 = vld [vmem:[#allocation11 + $0xf0] sm:$0xff]  }
 0x1d4   :  { %1720 = vmatpush1.bf16.msra.mxu0 %v2680_v9 }
 0x1d5   :  { %1721 = vmatprep.subr.bf16.mxu0 %v2688_v10 }
 0x1d8   :  { %1722 = vmatpush1.bf16.msra.mxu0 %v2686_v11 }
 0x1d9   :  { %1723 = vmatprep.subr.bf16.mxu0 %v2694_v12 }
 0x1dc   :  { %1724 = vmatpush1.bf16.msra.mxu0 %v2692_v13 }
 0x1dd   :  { %1725 = vmatprep.subr.bf16.mxu0 %v2700_v14 }
 0x1e0   :  { %1726 = vmatpush1.bf16.msra.mxu0 %v2698_v15 }
 0x1e1   :  { %1727 = vmatprep.subr.bf16.mxu0 %v2706_v16 }
 0x1e4   :  { %1728 = vmatpush1.bf16.msra.mxu0 %v2704_v21 }
 0x1e5   :  { %1729 = vmatprep.subr.bf16.mxu0 %v2712_v60  ;;  %v2740_v60 = vld [vmem:[#allocation11 + $0x90] sm:$0xff]  }
 0x1e8   :  { %1730 = vmatpush1.bf16.msra.mxu0 %v2710_v62  ;;  %v2742_v62 = vld [vmem:[#allocation11 + $0x98] sm:$0xff]  }
 0x1e9   :  { %1731 = vmatprep.subr.bf16.mxu0 %v2718_v1  ;;  %v2744_v1 = vld [vmem:[#allocation11 + $0xa0] sm:$0xff]  }
 0x1ec   :  { %1732 = vmatpush1.bf16.msra.mxu0 %v2716_v3  ;;  %v2746_v3 = vld [vmem:[#allocation11 + $0xa8] sm:$0xff]  }
 0x282   :  { %v910_v26 = vpop.f32.mrb[4].mxu0 }
 0x283   :  { %v2418_v27 = vadd.f32 %v910_v26, %v508_v24  ;;  %v912_v28 = vpop.f32.mrb[5].mxu0  ;;  %v1098_v26 = vmul.f32 0.31622776, %v1097_v19  ;;  %v2720_v19 = vld [vmem:[#allocation11] sm:$0xff]  }
 0x284   :  { %v2419_v29 = vadd.f32 %v912_v28, %v512_v25  ;;  %v914_v30 = vpop.f32.mrb[6].mxu0 }
 0x285   :  { %v917_v32 = vmax.f32 %v2418_v27, 0.0  ;;  %v915_v33 = vpop.f32.mrb[7].mxu0 }
 0x286   :  { %v918_v34 = vmax.f32 %v2419_v29, 0.0 }
 0x287   :  { %v919_v37 = vpack.c.bf16 %v917_v32, %v917_v32  ;;  %v2623_v32 = vld [vmem:[#allocation10] ss:$16 sps:$4 sm:$0xff]  }
 0x288   :  { %v920_v35 = vpack.c.bf16 %v918_v34, %v918_v34  ;;  %v2631_v34 = vld [vmem:[#allocation10 + $0x24] ss:$16 sps:$4 sm:$0xff]  }
 0x28a   :  { %1088 = vmatprep.mubr.bf16.mxu1 %v920_v35  ;;  %v2629_v35 = vld [vmem:[#allocation10 + $0x20] ss:$16 sps:$4 sm:$0xff]  }
 0x28b   :  { %1089 = vmatmul.mubr.bf16.vlgmr.msra.gmra.mrb[4].mxu1 %v919_v37  ;;  %v2635_v37 = vld [vmem:[#allocation10 + $0x40] ss:$16 sps:$4 sm:$0xff]  }
 0x28c   :  { %1210 = vmatpush1.bf16.msra.mxu1 %v2599_v36  ;;  %1241 = vmatprep.mubr.bf16.mxu1 %v2951_v0  ;;  %v2617_v0 = vld [vmem:[#allocation8 + $0x60] ss:$8 sps:$4 sm:$0xff]   ;;  %v2637_v36 = vld [vmem:[#allocation10 + $0x44] ss:$16 sps:$4 sm:$0xff]  }
 0x28d   :  { %1211 = vmatprep.subr.bf16.mxu1 %v2604_v38  ;;  %v2643_v38 = vld [vmem:[#allocation10 + $0x64] ss:$16 sps:$4 sm:$0xff]  }
 0x290   :  { %1212 = vmatpush1.bf16.msra.mxu1 %v2602_v39  ;;  %v2641_v39 = vld [vmem:[#allocation10 + $0x60] ss:$16 sps:$4 sm:$0xff]  }
 0x291   :  { %1213 = vmatprep.subr.bf16.mxu1 %v2607_v40  ;;  %v2649_v40 = vld [vmem:[#allocation10 + $0x84] ss:$16 sps:$4 sm:$0xff]  }
 0x294   :  { %1214 = vmatpush1.bf16.msra.mxu1 %v2605_v41  ;;  %v2647_v41 = vld [vmem:[#allocation10 + $0x80] ss:$16 sps:$4 sm:$0xff]  }
 0x295   :  { %1215 = vmatprep.subr.bf16.mxu1 %v2610_v42  ;;  %v2655_v42 = vld [vmem:[#allocation10 + $0xa4] ss:$16 sps:$4 sm:$0xff]  }
 0x298   :  { %1216 = vmatpush1.bf16.msra.mxu1 %v2608_v43  ;;  %v2653_v43 = vld [vmem:[#allocation10 + $0xa0] ss:$16 sps:$4 sm:$0xff]  }
 0x299   :  { %1217 = vmatprep.subr.bf16.mxu1 %v2613_v44  ;;  %v2661_v44 = vld [vmem:[#allocation10 + $0xc4] ss:$16 sps:$4 sm:$0xff]  }
 0x29c   :  { %1218 = vmatpush1.bf16.msra.mxu1 %v2611_v45  ;;  %v2659_v45 = vld [vmem:[#allocation10 + $0xc0] ss:$16 sps:$4 sm:$0xff]  }
 0x29d   :  { %1219 = vmatprep.subr.bf16.mxu1 %v2616_v46  ;;  %v2667_v46 = vld [vmem:[#allocation10 + $0xe4] ss:$16 sps:$4 sm:$0xff]  }
 0x2a0   :  { %1220 = vmatpush1.bf16.msra.mxu1 %v2614_v47  ;;  %v2665_v47 = vld [vmem:[#allocation10 + $0xe0] ss:$16 sps:$4 sm:$0xff]  }
 0x2a1   :  { %1221 = vmatprep.subr.bf16.mxu1 %v2619_v48  ;;  %v2673_v48 = vld [vmem:[#allocation10 + $0x104] ss:$16 sps:$4 sm:$0xff]  }
 0x2a4   :  { %1222 = vmatpush1.bf16.msra.mxu1 %v2617_v0  ;;  %v2671_v0 = vld [vmem:[#allocation10 + $0x100] ss:$16 sps:$4 sm:$0xff]  }
 0x2a5   :  { %1223 = vmatprep.subr.bf16.mxu1 %v2622_v49  ;;  %v2679_v49 = vld [vmem:[#allocation10 + $0x124] ss:$16 sps:$4 sm:$0xff]  }
 0x2a8   :  { %1224 = vmatpush1.bf16.msra.mxu1 %v2620_v50  ;;  %v2677_v50 = vld [vmem:[#allocation10 + $0x120] ss:$16 sps:$4 sm:$0xff]  }
 0x2a9   :  { %1660 = vmatprep.subr.bf16.mxu1 %v2625_v51  ;;  %v2685_v51 = vld [vmem:[#allocation10 + $0x144] ss:$16 sps:$4 sm:$0xff]  }
 0x35e   :  { %v2368_v22 = vpop.f32.mrb[4].mxu1 }
 0x35f   :  { %v2369_v24 = vpop.f32.mrb[5].mxu1 }
 0x360   :  { %v2370_v25 = vadd.f32 %v2369_v24, %v2368_v22  ;;  %v2371_v27 = vpop.f32.mrb[6].mxu1  ;;  %v2722_v24 = vld [vmem:[#allocation11 + $0x8] sm:$0xff]  }
 0x361   :  { %v2372_v28 = vpop.f32.mrb[7].mxu1  ;;  %v2725_v27 = vld [vmem:[#allocation11 + $0x58] sm:$0xff]  }
 0x362   :  { %v1091_v29 = vadd.f32 %v2370_v25, %v2222_v23  ;;  %v2721_v23 = vld [vmem:[#allocation11 + $0x48] sm:$0xff]   ;;  %v2723_v25 = vld [vmem:[#allocation11 + $0x50] sm:$0xff]   ;;  %v2726_v28 = vld [vmem:[#allocation11 + $0x18] sm:$0xff]  }
 0x364   :  { %v1099_v30 = vadd.f32 %v1098_v26, %v1091_v29  ;;  %1096 = vst [vmem:[#allocation13] sm:$0xff] %v1091_v29  ;;  %v2724_v26 = vld [vmem:[#allocation11 + $0x10] sm:$0xff]   ;;  %v2727_v29 = vld [vmem:[#allocation11 + $0x60] sm:$0xff]  }
 0x366   :  { %v1100_v33 = vpack.c.bf16 %v1099_v30, %v1099_v30  ;;  %v2728_v30 = vld [vmem:[#allocation11 + $0x20] sm:$0xff]  }
 0x368   :  { %1242 = vmatmul.mubr.bf16.vlgmr.msra.gmra.mrb[8].mxu1 %v1100_v33  ;;  %v2730_v33 = vld [vmem:[#allocation11 + $0x28] sm:$0xff]  }
 0x369   :  { %1661 = vmatpush1.bf16.msra.mxu1 %v2623_v32  ;;  %v2729_v32 = vld [vmem:[#allocation11 + $0x68] sm:$0xff]  }
 0x36a   :  { %1662 = vmatprep.subr.bf16.mxu1 %v2631_v34  ;;  %v2731_v34 = vld [vmem:[#allocation11 + $0x70] sm:$0xff]  }
 0x36d   :  { %1663 = vmatpush1.bf16.msra.mxu1 %v2629_v35  ;;  %v2732_v35 = vld [vmem:[#allocation11 + $0x30] sm:$0xff]  }
 0x36e   :  { %1664 = vmatprep.subr.bf16.mxu1 %v2637_v36  ;;  %v2733_v36 = vld [vmem:[#allocation11 + $0x78] sm:$0xff]  }
 0x371   :  { %1665 = vmatpush1.bf16.msra.mxu1 %v2635_v37  ;;  %v2734_v37 = vld [vmem:[#allocation11 + $0x38] sm:$0xff]  }
 0x372   :  { %1666 = vmatprep.subr.bf16.mxu1 %v2643_v38  ;;  %v2735_v38 = vld [vmem:[#allocation11 + $0xc0] sm:$0xff]  }
 0x375   :  { %1667 = vmatpush1.bf16.msra.mxu1 %v2641_v39  ;;  %v1318_v39 = vld [vmem:[%s3219_s11] sm:$0xf]  ;;  %s2952_s11 = smov [#allocation13]  }
 0x376   :  { %1668 = vmatprep.subr.bf16.mxu1 %v2649_v40  ;;  %v1323_v40 = vrot.slane %v1318_v39, %v3133_v18  ;;  %s2100_s15 = sshll.u32 %s2952_s11, 4  ;;  %s2101_s15 = int_to_ptr.vmem [resolvable:$true] %s2100_s15 }
 0x377   :  { %s2883_s6 = scalar_lea.vmem %s2101_s15, 128  ;;  %p2888_p7 = scmp.lt.s32.totalorder %s2101_s15, %s2101_s15 }
 0x378   :  { %p2884_p6 = scmp.ne.s32.totalorder %s2101_s15, %s2883_s6  ;;  %p2889_p8 = scmp.lt.s32.totalorder %s2883_s6, %s2883_s6 }
 0x379   :  { %1669 = vmatpush1.bf16.msra.mxu1 %v2647_v41  ;;  %v1327_v41 = vrot.slane %v1318_v39, %v3141_v20 }
 0x37a   :  { %1670 = vmatprep.subr.bf16.mxu1 %v2655_v42  ;;  %v1335_v42 = vrot.slane %v1318_v39, %v183_v31  ;;  %v2738_v31 = vld [vmem:[#allocation11 + $0x88] sm:$0xff]   ;;  %p2890_p9 = por %p2889_p8, %p2888_p7 }
 0x37c   :  { %p2891_p10 = pnand %p2890_p9, %p2884_p6 }
 0x37d   :  { %1671 = vmatpush1.bf16.msra.mxu1 %v2653_v43 }
 0x37e   :  { %1672 = vmatprep.subr.bf16.mxu1 %v2661_v44 }
 0x381   :  { %1673 = vmatpush1.bf16.msra.mxu1 %v2659_v45 }
 0x382   :  { %1674 = vmatprep.subr.bf16.mxu1 %v2667_v46 }
 0x385   :  { %1675 = vmatpush1.bf16.msra.mxu1 %v2665_v47 }
 0x386   :  { %1676 = vmatprep.subr.bf16.mxu1 %v2673_v48 }
 0x389   :  { %1677 = vmatpush1.bf16.msra.mxu1 %v2671_v0 }
 0x38a   :  { %1678 = vmatprep.subr.bf16.mxu1 %v2679_v49 }
 0x38d   :  { %1679 = vmatpush1.bf16.msra.mxu1 %v2677_v50 }
 0x38e   :  { %1680 = vmatprep.subr.bf16.mxu1 %v2685_v51 }
 0x391   :  { %1681 = vmatpush1.bf16.msra.mxu1 %v2683_v52 }
 0x392   :  { %1682 = vmatprep.subr.bf16.mxu1 %v2691_v53 }
 0x395   :  { %1683 = vmatpush1.bf16.msra.mxu1 %v2689_v54 }
 0x396   :  { %1684 = vmatprep.subr.bf16.mxu1 %v2697_v55 }
 0x399   :  { %1685 = vmatpush1.bf16.msra.mxu1 %v2695_v56  ;;  %v2736_v56 = vld [vmem:[#allocation11 + $0x80] sm:$0xff]  }
 0x39a   :  { %1686 = vmatprep.subr.bf16.mxu1 %v2703_v57  ;;  %v2737_v57 = vld [vmem:[#allocation11 + $0xc8] sm:$0xff]  }
 0x39d   :  { %1687 = vmatpush1.bf16.msra.mxu1 %v2701_v58 }
 0x39e   :  { %1688 = vmatprep.subr.bf16.mxu1 %v2709_v59  ;;  %v2739_v59 = vld [vmem:[#allocation11 + $0xd0] sm:$0xff]  }
 0x3a1   :  { %1689 = vmatpush1.bf16.msra.mxu1 %v2707_v61  ;;  %v2741_v61 = vld [vmem:[#allocation11 + $0xd8] sm:$0xff]  }
 0x3a2   :  { %1690 = vmatprep.subr.bf16.mxu1 %v2715_v63  ;;  %v2743_v63 = vld [vmem:[#allocation11 + $0xe0] sm:$0xff]  }
 0x3a5   :  { %1691 = vmatpush1.bf16.msra.mxu1 %v2713_v2  ;;  %v2745_v2 = vld [vmem:[#allocation11 + $0xe8] sm:$0xff]  }
 0x3a6   :  { %2374 = vmatprep.subr.bf16.mxu1 %v2719_v5  ;;  %v1331_v5 = vrot.slane %v1318_v39, %v179_v4 }
 0x43b   :  { %v1243_v9 = vpop.f32.mrb[8].mxu1 }
 0x43c   :  { %v1244_v10 = vadd.f32 %v1243_v9, %v1122_v7  ;;  %v1245_v11 = vpop.f32.mrb[9].mxu1  ;;  %v2748_v7 = vld [vmem:[#allocation11 + $0xb0] sm:$0xff]   ;;  %v2749_v9 = vld [vmem:[#allocation11 + $0xf8] sm:$0xff]  }
 0x43d   :  { %v1246_v12 = vadd.f32 %v1245_v11, %v1126_v8  ;;  %v1247_v13 = vpop.f32.mrb[10].mxu1 }
 0x43e   :  { %v1250_v14 = vmax.f32 %v1244_v10, 0.0  ;;  %v1248_v15 = vpop.f32.mrb[11].mxu1  ;;  %v2750_v10 = vld [vmem:[#allocation11 + $0xb8] sm:$0xff]  }
 0x43f   :  { %v1251_v16 = vmax.f32 %v1246_v12, 0.0 }
 0x440   :  { %v1252_v22 = vpack.c.bf16 %v1250_v14, %v1250_v14 }
 0x441   :  { %v1253_v21 = vpack.c.bf16 %v1251_v16, %v1251_v16 }
 0x443   :  { %1692 = vmatprep.mubr.bf16.mxu1 %v1253_v21  ;;  %1733 = vmatprep.mubr.bf16.mxu0 %v1253_v21 }
 0x444   :  { %1693 = vmatmul.mubr.bf16.vlgmr.msra.gmra.mrb[12].mxu1 %v1252_v22  ;;  %1734 = vmatmul.mubr.bf16.vlgmr.msra.gmra.mrb[8].mxu0 %v1252_v22 }
 0x445   :  { %2375 = vmatpush3.bf16.msra.mxu1 %v2720_v19 }
 0x446   :  { %2376 = vmatprep.subr.bf16.mxu1 %v2721_v23 }
 0x449   :  { %2377 = vmatpush3.bf16.msra.mxu1 %v2722_v24 }
 0x44a   :  { %2378 = vmatprep.subr.bf16.mxu1 %v2723_v25 }
 0x44d   :  { %2379 = vmatpush3.bf16.msra.mxu1 %v2724_v26 }
 0x44e   :  { %2380 = vmatprep.subr.bf16.mxu1 %v2725_v27 }
 0x451   :  { %2381 = vmatpush3.bf16.msra.mxu1 %v2726_v28 }
 0x452   :  { %2382 = vmatprep.subr.bf16.mxu1 %v2727_v29 }
 0x455   :  { %2383 = vmatpush3.bf16.msra.mxu1 %v2728_v30 }
 0x456   :  { %2384 = vmatprep.subr.bf16.mxu1 %v2729_v32 }
 0x459   :  { %2385 = vmatpush3.bf16.msra.mxu1 %v2730_v33 }
 0x45a   :  { %2386 = vmatprep.subr.bf16.mxu1 %v2731_v34 }
 0x45d   :  { %2387 = vmatpush3.bf16.msra.mxu1 %v2732_v35 }
 0x45e   :  { %2388 = vmatprep.subr.bf16.mxu1 %v2733_v36 }
 0x461   :  { %2389 = vmatpush3.bf16.msra.mxu1 %v2734_v37 }
 0x462   :  { %2396 = vmatprep.subr.bf16.mxu1 %v2735_v38 }
 0x517   :  { %v1694_v43 = vpop.f32.mrb[12].mxu1  ;;  %v1735_v44 = vpop.f32.mrb[8].mxu0 }
 0x518   :  { %v1695_v45 = vadd.f32 %v1694_v43, %v1323_v40  ;;  %v1696_v46 = vpop.f32.mrb[13].mxu1  ;;  %v1737_v47 = vpop.f32.mrb[9].mxu0  ;;  %v1736_v8 = vadd.f32 %v1735_v44, %v1331_v5 }
 0x519   :  { %v1697_v48 = vadd.f32 %v1696_v46, %v1327_v41  ;;  %v1738_v0 = vadd.f32 %v1737_v47, %v1335_v42  ;;  %v1698_v49 = vpop.f32.mrb[14].mxu1  ;;  %v1739_v50 = vpop.f32.mrb[10].mxu0 }
 0x51a   :  { %v1742_v51 = vmax.f32 %v1695_v45, 0.0  ;;  %v1699_v52 = vpop.f32.mrb[15].mxu1  ;;  %v1740_v53 = vpop.f32.mrb[11].mxu0  ;;  %v1744_v11 = vmax.f32 %v1736_v8, 0.0 }
 0x51b   :  { %v1743_v54 = vmax.f32 %v1697_v48, 0.0  ;;  %v1745_v55 = vmax.f32 %v1738_v0, 0.0 }
 0x51c   :  { %v1746_v20 = vpack.c.bf16 %v1742_v51, %v1742_v51  ;;  %v1748_v12 = vpack.c.bf16 %v1744_v11, %v1744_v11 }
 0x51d   :  { %v1747_v18 = vpack.c.bf16 %v1743_v54, %v1743_v54  ;;  %v1749_v58 = vpack.c.bf16 %v1745_v55, %v1745_v55 }
 0x51f   :  { %2045 = vmatprep.mubr.bf16.mxu1 %v1747_v18 }
 0x520   :  { %2046 = vmatmul.mubr.bf16.vlgmr.msra.gmra.mrb[16].mxu1 %v1746_v20 }
 0x521   :  { %2397 = vmatpush3.bf16.msra.mxu1 %v2736_v56  ;;  %2085 = vmatprep.mubr.bf16.mxu1 %v1749_v58 }
 0x522   :  { %2398 = vmatprep.subr.bf16.mxu1 %v2737_v57 }
 0x525   :  { %2399 = vmatpush3.bf16.msra.mxu1 %v2738_v31 }
 0x526   :  { %2400 = vmatprep.subr.bf16.mxu1 %v2739_v59 }
 0x529   :  { %2401 = vmatpush3.bf16.msra.mxu1 %v2740_v60 }
 0x52a   :  { %2402 = vmatprep.subr.bf16.mxu1 %v2741_v61 }
 0x52d   :  { %2403 = vmatpush3.bf16.msra.mxu1 %v2742_v62 }
 0x52e   :  { %2404 = vmatprep.subr.bf16.mxu1 %v2743_v63 }
 0x531   :  { %2405 = vmatpush3.bf16.msra.mxu1 %v2744_v1 }
 0x532   :  { %2406 = vmatprep.subr.bf16.mxu1 %v2745_v2 }
 0x535   :  { %2407 = vmatpush3.bf16.msra.mxu1 %v2746_v3 }
 0x536   :  { %2408 = vmatprep.subr.bf16.mxu1 %v2747_v6 }
 0x539   :  { %2409 = vmatpush3.bf16.msra.mxu1 %v2748_v7 }
 0x53a   :  { %2410 = vmatprep.subr.bf16.mxu1 %v2749_v9 }
 0x53d   :  { %2411 = vmatpush3.bf16.msra.mxu1 %v2750_v10 }
 0x540   :  { %2086 = vmatmul.mubr.bf16.vlgmr.msra.gmra.mrb[20].mxu1 %v1748_v12 }
 0x541   :  { %2894 = shalt.err (!%p2891_p10)
}
 0x542   :  { %s2895_s23 = scalar_lea.hbm %s3222_s14, 128 }
 0x543   :  { %p2896_p11 = scmp.ne.s32.totalorder %s3222_s14, %s2895_s23  ;;  %p2899_p12 = scmp.lt.u32.totalorder %s2895_s23, %s3222_s14 }
 0x545   :  { %p2901_p13 = pnand %p2899_p12, %p2896_p11 }
 0x547   :  { %2904 = shalt.err (!%p2901_p13)
}
 0x548   :  { %2103 = dma.vmem_to_hbm [thread:$0]  %s2101_s15, 128, %s3222_s14, [#allocation4]   ;;  %v2319_v16 = vld [vmem:[%s3221_s13] ss:$0 sm:$0xff] }
 0x549   :  { %s2953_s8 = smov [#allocation14]  }
 0x54a   :  { %s2110_s12 = sshll.u32 %s2953_s8, 4  ;;  %s2111_s12 = int_to_ptr.vmem [resolvable:$true] %s2110_s12 }
 0x54b   :  { %s2905_s14 = scalar_lea.vmem %s2111_s12, 128  ;;  %p2910_p1 = scmp.lt.s32.totalorder %s2111_s12, %s2111_s12 }
 0x54c   :  { %p2906_p0 = scmp.ne.s32.totalorder %s2111_s12, %s2905_s14  ;;  %p2911_p2 = scmp.lt.s32.totalorder %s2905_s14, %s2905_s14 }
 0x54e   :  { %p2912_p3 = por %p2911_p2, %p2910_p1 }
 0x550   :  { %p2913_p4 = pnand %p2912_p3, %p2906_p0 }
 0x5f3   :  { %v2390_v17 = vpop.f32.mrb[16].mxu1 }
 0x5f4   :  { %v2391_v4 = vpop.f32.mrb[17].mxu1 }
 0x5f5   :  { %v2392_v13 = vadd.f32 %v2391_v4, %v2390_v17  ;;  %v2393_v14 = vpop.f32.mrb[18].mxu1 }
 0x5f6   :  { %v2394_v15 = vpop.f32.mrb[19].mxu1 }
 0x5f7   :  { %v2048_v22 = vadd.f32 %v2392_v13, %v2319_v16 }
 0x613   :  { %v2412_v21 = vpop.f32.mrb[20].mxu1 }
 0x614   :  { %v2413_v19 = vpop.f32.mrb[21].mxu1 }
 0x615   :  { %v2414_v23 = vadd.f32 %v2413_v19, %v2412_v21  ;;  %v2415_v24 = vpop.f32.mrb[22].mxu1 }
 0x616   :  { %v2416_v25 = vpop.f32.mrb[23].mxu1 }
 0x617   :  { %v2088_v26 = vadd.f32 %v2414_v23, %v2048_v22 }
 0x619   :  { %2093 = vst [vmem:[#allocation14] sm:$0xff] %v2088_v26 }
 0x61a   :  { %2916 = shalt.err (!%p2913_p4)
}
 0x61b   :  { %s3226_s0 = sld [smem:[#allocation22_spill]] }
 0x621   :  { %s2917_s2 = scalar_lea.hbm %s3226_s0, 128 }
 0x622   :  { %p2918_p5 = scmp.ne.s32.totalorder %s3226_s0, %s2917_s2  ;;  %p2921_p6 = scmp.lt.u32.totalorder %s2917_s2, %s3226_s0 }
 0x624   :  { %p2923_p7 = pnand %p2921_p6, %p2918_p5 }
 0x626   :  { %2926 = shalt.err (!%p2923_p7)
}
 0x627   :  { %2113 = dma.vmem_to_hbm [thread:$0]  %s2111_s12, 128, %s3226_s0, [#allocation15]  }
 0x628   :  { %2935 = dma.done.wait [#allocation4], 128  }
 0x629   :  { %2936 = vsyncadd [#allocation4], 4294967168 }
 0x62a   :  { %2937 = dma.done.wait [#allocation15], 128  }
 0x62b   :  { %2938 = vsyncadd [#allocation15], 4294967168 }
 0x62c   :  { %2120 = vsyncpa [#allocation3], 1 }
 0x62d   :  { %2121 = vsyncpa [#allocation6], 1 }
 0x62e   :  { %2122 = vsyncpa [#allocation9], 1 }
 0x62f   :  { %2123 = vsyncpa [#allocation12], 1 }
 0x630   :  { %2124 = vsyncpa [#allocation4], 1 }
 0x631   :  { %2125 = vsyncpa [#allocation15], 1 }

</bundles_post_ra>
